<compile_context>
chip_gen: v5e
topology: v5e:2x2
jax: 0.10.0
libtpu: 0.0.40
codegen_flags: <defaults>
</compile_context>

<pallas_src>
import math
from functools import partial

import jax
import jax.numpy as jnp
from jax.experimental import pallas as pl
from jax.experimental.pallas import tpu as pltpu


def _round_up(x, m):
    return (x + m - 1) // m * m


def _pow2_geq(x):
    x = max(int(x), 1)
    return 1 << (x - 1).bit_length()


# packed per-face column layout (K = 32 lanes)
_A0, _A1, _A2 = 0, 1, 2            # barycentric coefficients, already * 1/det
_B0, _B1, _B2 = 3, 4, 5
_C0, _C1, _C2 = 6, 7, 8
_X0, _Y0, _X1, _Y1, _X2, _Y2 = 9, 10, 11, 12, 13, 14
_IL01, _IL12, _IL20 = 15, 16, 17   # 1 / squared edge length
_IZ0, _IZ1, _IZ2 = 18, 19, 20      # 1 / vertex depth
_TEX0 = 21                         # 9 per-vertex RGB values
_RGB_GATE, _ALPHA_GATE = 30, 31    # (valid & (frontside|fill_back)), valid
_K = 32

_CH = 8                            # faces per inner sub-chunk (sublanes)


def _soft_rasterize_kernel(xp_ref, yp_ref, fd_ref, out_ref,
                           m_acc, den_acc, num_acc, prod_acc, *,
                           background_color, near, far, eps,
                           inv_sigma, dist_threshold, inv_gamma, inv_range,
                           n_chunks):
    f_idx = pl.program_id(2)

    @pl.when(f_idx == 0)
    def _init():
        m_acc[...] = jnp.full_like(m_acc, eps)        # running softmax max (>= eps)
        den_acc[...] = jnp.zeros_like(den_acc)        # running softmax denominator (w/o bg term)
        num_acc[...] = jnp.zeros_like(num_acc)        # running RGB numerators
        prod_acc[...] = jnp.ones_like(prod_acc)       # running prod(1 - D) per sublane row

    xp = xp_ref[...]                                  # (1, Pt)
    yp = yp_ref[...]                                  # (1, Pt)

    def chunk_body(c):
        if isinstance(c, int):
            base = c * _CH
        else:
            base = pl.multiple_of(c * _CH, _CH)
        fd = fd_ref[0, pl.ds(base, _CH), :]           # (8, 32)

        def col(k):
            return fd[:, k:k + 1]                     # (8, 1)

        # barycentric coordinates (coefficients pre-divided by det in the wrapper);
        # w0 + w1 + w2 == 1, so all > 0 already implies all < 1.
        w0 = col(_A0) * xp + col(_A1) * yp + col(_A2)     # (8, Pt)
        w1 = col(_B0) * xp + col(_B1) * yp + col(_B2)
        w2 = col(_C0) * xp + col(_C1) * yp + col(_C2)
        inside = (w0 > 0) & (w1 > 0) & (w2 > 0)

        x0, y0 = col(_X0), col(_Y0)
        x1, y1 = col(_X1), col(_Y1)
        x2, y2 = col(_X2), col(_Y2)

        # squared distance to the triangle boundary (min over the 3 edge segments)
        def edge_d2(ax, ay, bx, by, inv_l2):
            ex, ey = bx - ax, by - ay
            px, py = xp - ax, yp - ay
            t = jnp.clip((px * ex + py * ey) * inv_l2, 0.0, 1.0)
            dx = px - t * ex
            dy = py - t * ey
            return dx * dx + dy * dy

        dis = jnp.minimum(edge_d2(x0, y0, x1, y1, col(_IL01)),
                          jnp.minimum(edge_d2(x1, y1, x2, y2, col(_IL12)),
                                      edge_d2(x2, y2, x0, y0, col(_IL20))))

        alpha_gate = col(_ALPHA_GATE) > 0.5
        rgb_gate = col(_RGB_GATE) > 0.5
        keep = (inside | (dis < dist_threshold)) & alpha_gate

        # soft fragment probability D; exponent clamped so far faces give ~0 without inf
        frag = pl.reciprocal(
            1.0 + jnp.exp(jnp.minimum(jnp.where(inside, -dis, dis) * inv_sigma, 80.0)),
            approx=True)

        # ---- alpha: running product of (1 - D), kept as an (8, Pt) accumulator ----
        prod_acc[...] = prod_acc[...] * jnp.where(keep, 1.0 - frag, 1.0)

        # ---- rgb: online softmax over faces (flash-attention style rescaling) ----
        cb0 = jnp.clip(w0, 0.0, 1.0)
        cb1 = jnp.clip(w1, 0.0, 1.0)
        cb2 = jnp.clip(w2, 0.0, 1.0)
        inv_s = pl.reciprocal(jnp.maximum(cb0 + cb1 + cb2, 1e-5), approx=True)
        cb0, cb1, cb2 = cb0 * inv_s, cb1 * inv_s, cb2 * inv_s
        zd = cb0 * col(_IZ0) + cb1 * col(_IZ1) + cb2 * col(_IZ2)
        # exact reciprocal: zp feeds exp((.)*1/gamma) with gamma=1e-4, so approx
        # reciprocal error would distort the per-face softmax weights.
        zp = 1.0 / jnp.maximum(zd, 1e-10)
        zp_norm = (far - zp) * inv_range

        rgb_valid = keep & rgb_gate & (zp >= near) & (zp <= far)
        z_masked = jnp.where(rgb_valid, zp_norm, -jnp.inf)
        tile_max = jnp.max(z_masked, axis=0, keepdims=True)          # (1, Pt)

        m_prev = m_acc[...]
        m_new = jnp.maximum(m_prev, tile_max)
        rescale = jnp.exp((m_prev - m_new) * inv_gamma)              # (1, Pt)
        wgt = jnp.exp((z_masked - m_new) * inv_gamma) * frag         # (8, Pt)

        den_acc[...] = den_acc[...] * rescale + jnp.sum(wgt, axis=0, keepdims=True)
        sums = []
        for k in range(3):
            color_k = (cb0 * col(_TEX0 + k) + cb1 * col(_TEX0 + 3 + k)
                       + cb2 * col(_TEX0 + 6 + k))
            sums.append(jnp.sum(wgt * color_k, axis=0, keepdims=True))
        num_acc[...] = num_acc[...] * rescale + jnp.concatenate(sums, axis=0)
        m_acc[...] = m_new

    if n_chunks <= 2:
        for c in range(n_chunks):
            chunk_body(c)
    else:
        @pl.loop(0, n_chunks)
        def _chunks(c):
            chunk_body(c)

    # ---- finalize on the last face tile ----
    @pl.when(f_idx == pl.num_programs(2) - 1)
    def _finalize():
        m = m_acc[...]                                            # (1, Pt)
        ebg = jnp.exp((eps - m) * inv_gamma)                      # background weight
        inv_den = 1.0 / (ebg + den_acc[...])                      # exact, once per tile
        numer = num_acc[...]                                      # (3, Pt)
        chans = [(numer[k:k + 1] + ebg * background_color[k]) * inv_den
                 for k in range(3)]
        p = prod_acc[...]                                         # (8, Pt) -> collapse
        r = p[0:4] * p[4:8]
        r = r[0:2] * r[2:4]
        alpha = jnp.clip(1.0 - r[0:1] * r[1:2], 0.0, 1.0)
        out_ref[0] = jnp.concatenate(chans + [alpha], axis=0).astype(out_ref.dtype)


def _pack_face_data(face_vertices, face_textures, F_pad, fill_back):
    """Precompute all per-face quantities (plain JAX) into a (B, F_pad, 32) array."""
    B, F = face_vertices.shape[:2]
    fv = face_vertices.astype(jnp.float32)
    tx = face_textures.astype(jnp.float32).reshape(B, F, 9)
    pad = F_pad - F
    if pad:
        pad_xy = jnp.zeros((B, pad, 3, 2), jnp.float32)
        pad_z = jnp.ones((B, pad, 3, 1), jnp.float32)        # z=1 keeps 1/z finite
        fv = jnp.concatenate([fv, jnp.concatenate([pad_xy, pad_z], axis=-1)], axis=1)
        tx = jnp.concatenate([tx, jnp.zeros((B, pad, 9), jnp.float32)], axis=1)
    valid = jnp.broadcast_to((jnp.arange(F_pad) < F).astype(jnp.float32)[None],
                             (B, F_pad))

    x0, y0, z0 = fv[..., 0, 0], fv[..., 0, 1], fv[..., 0, 2]
    x1, y1, z1 = fv[..., 1, 0], fv[..., 1, 1], fv[..., 1, 2]
    x2, y2, z2 = fv[..., 2, 0], fv[..., 2, 1], fv[..., 2, 2]

    det = x2 * (y0 - y1) + x0 * (y1 - y2) + x1 * (y2 - y0)
    det = jnp.where(det > 0, jnp.maximum(det, 1e-10), jnp.minimum(det, -1e-10))
    inv_det = 1.0 / det

    def inv_len2(ax, ay, bx, by):
        ex, ey = bx - ax, by - ay
        return 1.0 / jnp.maximum(ex * ex + ey * ey, 1e-10)

    frontside = ((y2 - y0) * (x1 - x0) < (y1 - y0) * (x2 - x0)).astype(jnp.float32)
    rgb_gate = valid if fill_back else valid * frontside

    cols = [(y1 - y2) * inv_det, (x2 - x1) * inv_det, (x1 * y2 - x2 * y1) * inv_det,
            (y2 - y0) * inv_det, (x0 - x2) * inv_det, (x2 * y0 - x0 * y2) * inv_det,
            (y0 - y1) * inv_det, (x1 - x0) * inv_det, (x0 * y1 - x1 * y0) * inv_det,
            x0, y0, x1, y1, x2, y2,
            inv_len2(x0, y0, x1, y1), inv_len2(x1, y1, x2, y2), inv_len2(x2, y2, x0, y0),
            1.0 / z0, 1.0 / z1, 1.0 / z2]
    cols += [tx[..., k] for k in range(9)]
    cols += [rgb_gate, valid]
    return jnp.stack(cols, axis=-1)                   # (B, F_pad, 32)


def soft_rasterize(face_vertices, face_textures, *, image_size=16,
                   background_color=(0.0, 0.0, 0.0), near=1.0, far=100.0,
                   fill_back=False, eps=1e-3, sigma_val=1e-5,
                   dist_eps=1e-4, gamma_val=1e-4):
    B, F = face_vertices.shape[:2]
    isz = int(image_size)
    P = isz * isz

    # pixel tiling along lanes: multiple of 128, <= 512 lanes per tile so the
    # (8, P_tile) chunk temporaries stay near register-resident; force at least
    # two parallel grid units when batch alone would leave a v7x core idle.
    P128 = _round_up(P, 128)
    n_ptiles = -(-P128 // 512)
    if B * n_ptiles < 2 and P128 > 128:
        n_ptiles = 2
    P_tile = _round_up(-(-P128 // n_ptiles), 128)
    P_pad = P_tile * n_ptiles

    # face tiling along sublanes: power of two in [8, 128]; the kernel iterates
    # over 8-face sub-chunks inside each tile (amortizes grid-step overhead
    # without materializing large (F_tile, P_tile) temporaries).
    F_tile = max(_CH, min(128, _pow2_geq(F)))
    F_pad = _round_up(F, F_tile)
    n_ftiles = F_pad // F_tile
    n_chunks = F_tile // _CH

    fd = _pack_face_data(face_vertices, face_textures, F_pad, bool(fill_back))

    # pixel centers in NDC (y flipped), matching the CUDA kernel: (2*i + 1 - is)/is
    pn = jnp.arange(P_pad)
    xi = (pn % isz).astype(jnp.float32)
    yi = (isz - 1 - pn // isz).astype(jnp.float32)
    xp = ((2.0 * xi + 1.0 - isz) / isz).reshape(1, P_pad)
    yp = ((2.0 * yi + 1.0 - isz) / isz).reshape(1, P_pad)

    # SoftRas converts dist_eps to a squared-distance cutoff sigma * log(1/dist_eps - 1).
    # TODO(synk): the stripped C++ binding may use dist_eps*sigma directly; the cutoff only gates faces.
    dist_threshold = float(sigma_val * math.log(1.0 / dist_eps - 1.0))

    kernel = partial(_soft_rasterize_kernel,
                     background_color=tuple(float(c) for c in background_color),
                     near=float(near), far=float(far), eps=float(eps),
                     inv_sigma=float(1.0 / sigma_val),
                     dist_threshold=dist_threshold,
                     inv_gamma=float(1.0 / gamma_val),
                     inv_range=float(1.0 / (far - near)),
                     n_chunks=int(n_chunks))

    # explicit VMEM budget: double-buffered blocks + scratch + chunk temporaries
    vmem_bytes = 4 * (2 * F_tile * _K          # face-data block (double buffered)
                      + 2 * 2 * P_tile         # xp, yp blocks
                      + 2 * 4 * P_tile         # output block
                      + (2 + 3 + _CH) * P_tile  # accumulator scratch
                      + 64 * _CH * P_tile)     # headroom for compiler temporaries
    vmem_limit = int(min(32 * 1024 * 1024, max(16 * 1024 * 1024, 4 * vmem_bytes)))

    out_flat = pl.pallas_call(
        kernel,
        out_shape=jax.ShapeDtypeStruct((B, 4, P_pad), jnp.float32),
        grid_spec=pltpu.PrefetchScalarGridSpec(
            num_scalar_prefetch=0,
            grid=(B, n_ptiles, n_ftiles),
            in_specs=[pl.BlockSpec((1, P_tile), lambda b, p, f: (0, p)),
                      pl.BlockSpec((1, P_tile), lambda b, p, f: (0, p)),
                      pl.BlockSpec((1, F_tile, _K), lambda b, p, f: (b, f, 0))],
            out_specs=pl.BlockSpec((1, 4, P_tile), lambda b, p, f: (b, 0, p)),
            scratch_shapes=[pltpu.VMEM((1, P_tile), jnp.float32),    # running max
                            pltpu.VMEM((1, P_tile), jnp.float32),    # running denom
                            pltpu.VMEM((3, P_tile), jnp.float32),    # running RGB numer
                            pltpu.VMEM((_CH, P_tile), jnp.float32)]),  # running prod(1-D)
        compiler_params=pltpu.CompilerParams(
            dimension_semantics=("parallel", "parallel", "arbitrary"),
            vmem_limit_bytes=vmem_limit),
    )(xp, yp, fd)

    return out_flat[:, :, :P].reshape(B, 4, isz, isz)


class SoftRasterizer:
    """JAX/Pallas equivalent of the PyTorch SoftRasterizer module (forward only)."""

    def __init__(self, image_size=50, background_color=(0, 0, 0), near=1, far=100,
                 anti_aliasing=False, fill_back=False, eps=1e-3, sigma_val=1e-5,
                 dist_eps=1e-4, gamma_val=1e-4):
        self.image_size = image_size
        self.background_color = background_color
        self.near = near
        self.far = far
        self.anti_aliasing = anti_aliasing
        self.fill_back = fill_back
        self.eps = eps
        self.sigma_val = sigma_val
        self.dist_eps = dist_eps
        self.gamma_val = gamma_val

    def __call__(self, face_vertices, face_textures):
        isz = self.image_size * (2 if self.anti_aliasing else 1)
        images = soft_rasterize(
            face_vertices, face_textures, image_size=isz,
            background_color=self.background_color, near=self.near, far=self.far,
            fill_back=self.fill_back, eps=self.eps, sigma_val=self.sigma_val,
            dist_eps=self.dist_eps, gamma_val=self.gamma_val)
        if self.anti_aliasing:
            # avg_pool2d(kernel=2, stride=2) — plain-JAX glue
            B, C, H, W = images.shape
            images = images.reshape(B, C, H // 2, 2, W // 2, 2).mean(axis=(3, 5))
        return images


if __name__ == "__main__":
    key = jax.random.PRNGKey(0)
    B, F, isz = 2, 8, 16
    k1, k2, k3 = jax.random.split(key, 3)
    xy = jax.random.uniform(k1, (B, F, 3, 2), minval=-0.9, maxval=0.9)
    z = jax.random.uniform(k2, (B, F, 3, 1), minval=2.0, maxval=50.0)
    face_vertices = jnp.concatenate([xy, z], axis=-1).astype(jnp.float32)   # [B, F, 3, 3]
    face_textures = jax.random.uniform(k3, (B, F, 3, 3)).astype(jnp.float32)

    rasterizer = SoftRasterizer(image_size=isz, background_color=[0, 0, 0],
                                fill_back=True, anti_aliasing=False)
    images = rasterizer(face_vertices, face_textures)
    images = jax.block_until_ready(images)

    assert images.shape == (B, 4, isz, isz), images.shape
    assert bool(jnp.all(jnp.isfinite(images)))
    assert bool(jnp.all((images[:, 3] >= 0.0) & (images[:, 3] <= 1.0)))
    print("KERNEL_OK")
</pallas_src>

<mosaic_0001>
module attributes {stable_mosaic.version = 11 : i64} {
  func.func @_soft_rasterize_kernel(%arg0: i32, %arg1: i32, %arg2: i32, %arg3: memref<1x256xf32, #tpu.memory_space<vmem>>, %arg4: memref<1x256xf32, #tpu.memory_space<vmem>>, %arg5: memref<1x8x32xf32, #tpu.memory_space<vmem>>, %arg6: memref<1x4x256xf32, #tpu.memory_space<vmem>>, %arg7: memref<1x256xf32, #tpu.memory_space<vmem>>, %arg8: memref<1x256xf32, #tpu.memory_space<vmem>>, %arg9: memref<3x256xf32, #tpu.memory_space<vmem>>, %arg10: memref<8x256xf32, #tpu.memory_space<vmem>>) attributes {dimension_semantics = [#tpu.dimension_semantics<parallel>, #tpu.dimension_semantics<parallel>, #tpu.dimension_semantics<arbitrary>], iteration_bounds = array<i64: 2, 1, 1>, scalar_prefetch = 0 : i64, scratch_operands = 4 : i64, tpu.core_type = #tpu.core_type<tc>, window_params = [{transform_indices = @transform_0, window_bounds = array<i64: 1, 256>}, {transform_indices = @transform_1, window_bounds = array<i64: 1, 256>}, {transform_indices = @transform_2, window_bounds = array<i64: 1, 8, 32>}, {transform_indices = @transform_3, window_bounds = array<i64: 1, 4, 256>}]} {
    %c0_i32 = arith.constant 0 : i32
    %0 = arith.cmpi eq, %arg2, %c0_i32 : i32
    %1 = arith.extui %0 : i1 to i32
    %c0_i32_0 = arith.constant 0 : i32
    %2 = arith.cmpi ne, %1, %c0_i32_0 : i32
    scf.if %2 {
      %cst_63 = arith.constant 1.000000e-03 : f32
      %296 = vector.broadcast %cst_63 : f32 to vector<1x256xf32>
      %c0_64 = arith.constant 0 : index
      %c0_65 = arith.constant 0 : index
      %297 = vector.load %arg7[%c0_64, %c0_65] : memref<1x256xf32, #tpu.memory_space<vmem>>, vector<1x256xf32>
      tpu.vector_store %arg7[%c0_64, %c0_65], %296 {strides = array<i32>} : memref<1x256xf32, #tpu.memory_space<vmem>>, vector<1x256xf32>,
      %cst_66 = arith.constant 0.000000e+00 : f32
      %298 = vector.broadcast %cst_66 : f32 to vector<1x256xf32>
      %c0_67 = arith.constant 0 : index
      %c0_68 = arith.constant 0 : index
      %299 = vector.load %arg8[%c0_67, %c0_68] : memref<1x256xf32, #tpu.memory_space<vmem>>, vector<1x256xf32>
      tpu.vector_store %arg8[%c0_67, %c0_68], %298 {strides = array<i32>} : memref<1x256xf32, #tpu.memory_space<vmem>>, vector<1x256xf32>,
      %cst_69 = arith.constant 0.000000e+00 : f32
      %300 = vector.broadcast %cst_69 : f32 to vector<3x256xf32>
      %c0_70 = arith.constant 0 : index
      %c0_71 = arith.constant 0 : index
      %301 = vector.load %arg9[%c0_70, %c0_71] : memref<3x256xf32, #tpu.memory_space<vmem>>, vector<3x256xf32>
      tpu.vector_store %arg9[%c0_70, %c0_71], %300 {strides = array<i32>} : memref<3x256xf32, #tpu.memory_space<vmem>>, vector<3x256xf32>,
      %cst_72 = arith.constant 1.000000e+00 : f32
      %302 = vector.broadcast %cst_72 : f32 to vector<8x256xf32>
      %c0_73 = arith.constant 0 : index
      %c0_74 = arith.constant 0 : index
      %303 = vector.load %arg10[%c0_73, %c0_74] : memref<8x256xf32, #tpu.memory_space<vmem>>, vector<8x256xf32>
      tpu.vector_store %arg10[%c0_73, %c0_74], %302 {strides = array<i32>} : memref<8x256xf32, #tpu.memory_space<vmem>>, vector<8x256xf32>,
    } else {
    }
    %c0 = arith.constant 0 : index
    %c0_1 = arith.constant 0 : index
    %3 = vector.load %arg3[%c0, %c0_1] : memref<1x256xf32, #tpu.memory_space<vmem>>, vector<1x256xf32>
    %c0_2 = arith.constant 0 : index
    %c0_3 = arith.constant 0 : index
    %4 = vector.load %arg4[%c0_2, %c0_3] : memref<1x256xf32, #tpu.memory_space<vmem>>, vector<1x256xf32>
    %c0_4 = arith.constant 0 : index
    %c0_5 = arith.constant 0 : index
    %c0_6 = arith.constant 0 : index
    %5 = vector.load %arg5[%c0_4, %c0_5, %c0_6] : memref<1x8x32xf32, #tpu.memory_space<vmem>>, vector<1x8x32xf32>
    %6 = vector.shape_cast %5 : vector<1x8x32xf32> to vector<8x32xf32>
    %7 = vector.extract_strided_slice %6 {offsets = [0, 0], sizes = [8, 1], strides = [1, 1]} : vector<8x32xf32> to vector<8x1xf32>
    %8 = vector.broadcast %7 : vector<8x1xf32> to vector<8x256xf32>
    %9 = vector.broadcast %3 : vector<1x256xf32> to vector<8x256xf32>
    %10 = arith.mulf %8, %9 : vector<8x256xf32>
    %11 = vector.extract_strided_slice %6 {offsets = [0, 1], sizes = [8, 1], strides = [1, 1]} : vector<8x32xf32> to vector<8x1xf32>
    %12 = vector.broadcast %11 : vector<8x1xf32> to vector<8x256xf32>
    %13 = vector.broadcast %4 : vector<1x256xf32> to vector<8x256xf32>
    %14 = arith.mulf %12, %13 : vector<8x256xf32>
    %15 = arith.addf %10, %14 : vector<8x256xf32>
    %16 = vector.extract_strided_slice %6 {offsets = [0, 2], sizes = [8, 1], strides = [1, 1]} : vector<8x32xf32> to vector<8x1xf32>
    %17 = vector.broadcast %16 : vector<8x1xf32> to vector<8x256xf32>
    %18 = arith.addf %15, %17 : vector<8x256xf32>
    %19 = vector.extract_strided_slice %6 {offsets = [0, 3], sizes = [8, 1], strides = [1, 1]} : vector<8x32xf32> to vector<8x1xf32>
    %20 = vector.broadcast %19 : vector<8x1xf32> to vector<8x256xf32>
    %21 = vector.broadcast %3 : vector<1x256xf32> to vector<8x256xf32>
    %22 = arith.mulf %20, %21 : vector<8x256xf32>
    %23 = vector.extract_strided_slice %6 {offsets = [0, 4], sizes = [8, 1], strides = [1, 1]} : vector<8x32xf32> to vector<8x1xf32>
    %24 = vector.broadcast %23 : vector<8x1xf32> to vector<8x256xf32>
    %25 = vector.broadcast %4 : vector<1x256xf32> to vector<8x256xf32>
    %26 = arith.mulf %24, %25 : vector<8x256xf32>
    %27 = arith.addf %22, %26 : vector<8x256xf32>
    %28 = vector.extract_strided_slice %6 {offsets = [0, 5], sizes = [8, 1], strides = [1, 1]} : vector<8x32xf32> to vector<8x1xf32>
    %29 = vector.broadcast %28 : vector<8x1xf32> to vector<8x256xf32>
    %30 = arith.addf %27, %29 : vector<8x256xf32>
    %31 = vector.extract_strided_slice %6 {offsets = [0, 6], sizes = [8, 1], strides = [1, 1]} : vector<8x32xf32> to vector<8x1xf32>
    %32 = vector.broadcast %31 : vector<8x1xf32> to vector<8x256xf32>
    %33 = vector.broadcast %3 : vector<1x256xf32> to vector<8x256xf32>
    %34 = arith.mulf %32, %33 : vector<8x256xf32>
    %35 = vector.extract_strided_slice %6 {offsets = [0, 7], sizes = [8, 1], strides = [1, 1]} : vector<8x32xf32> to vector<8x1xf32>
    %36 = vector.broadcast %35 : vector<8x1xf32> to vector<8x256xf32>
    %37 = vector.broadcast %4 : vector<1x256xf32> to vector<8x256xf32>
    %38 = arith.mulf %36, %37 : vector<8x256xf32>
    %39 = arith.addf %34, %38 : vector<8x256xf32>
    %40 = vector.extract_strided_slice %6 {offsets = [0, 8], sizes = [8, 1], strides = [1, 1]} : vector<8x32xf32> to vector<8x1xf32>
    %41 = vector.broadcast %40 : vector<8x1xf32> to vector<8x256xf32>
    %42 = arith.addf %39, %41 : vector<8x256xf32>
    %cst = arith.constant 0.000000e+00 : f32
    %43 = vector.broadcast %cst : f32 to vector<8x256xf32>
    %44 = arith.cmpf ogt, %18, %43 : vector<8x256xf32>
    %cst_7 = arith.constant 0.000000e+00 : f32
    %45 = vector.broadcast %cst_7 : f32 to vector<8x256xf32>
    %46 = arith.cmpf ogt, %30, %45 : vector<8x256xf32>
    %47 = arith.andi %44, %46 : vector<8x256xi1>
    %cst_8 = arith.constant 0.000000e+00 : f32
    %48 = vector.broadcast %cst_8 : f32 to vector<8x256xf32>
    %49 = arith.cmpf ogt, %42, %48 : vector<8x256xf32>
    %50 = arith.andi %47, %49 : vector<8x256xi1>
    %51 = vector.extract_strided_slice %6 {offsets = [0, 9], sizes = [8, 1], strides = [1, 1]} : vector<8x32xf32> to vector<8x1xf32>
    %52 = vector.extract_strided_slice %6 {offsets = [0, 10], sizes = [8, 1], strides = [1, 1]} : vector<8x32xf32> to vector<8x1xf32>
    %53 = vector.extract_strided_slice %6 {offsets = [0, 11], sizes = [8, 1], strides = [1, 1]} : vector<8x32xf32> to vector<8x1xf32>
    %54 = vector.extract_strided_slice %6 {offsets = [0, 12], sizes = [8, 1], strides = [1, 1]} : vector<8x32xf32> to vector<8x1xf32>
    %55 = vector.extract_strided_slice %6 {offsets = [0, 13], sizes = [8, 1], strides = [1, 1]} : vector<8x32xf32> to vector<8x1xf32>
    %56 = vector.extract_strided_slice %6 {offsets = [0, 14], sizes = [8, 1], strides = [1, 1]} : vector<8x32xf32> to vector<8x1xf32>
    %57 = vector.extract_strided_slice %6 {offsets = [0, 15], sizes = [8, 1], strides = [1, 1]} : vector<8x32xf32> to vector<8x1xf32>
    %58 = arith.subf %53, %51 : vector<8x1xf32>
    %59 = arith.subf %54, %52 : vector<8x1xf32>
    %60 = vector.broadcast %3 : vector<1x256xf32> to vector<8x256xf32>
    %61 = vector.broadcast %51 : vector<8x1xf32> to vector<8x256xf32>
    %62 = arith.subf %60, %61 : vector<8x256xf32>
    %63 = vector.broadcast %4 : vector<1x256xf32> to vector<8x256xf32>
    %64 = vector.broadcast %52 : vector<8x1xf32> to vector<8x256xf32>
    %65 = arith.subf %63, %64 : vector<8x256xf32>
    %66 = vector.broadcast %58 : vector<8x1xf32> to vector<8x256xf32>
    %67 = arith.mulf %62, %66 : vector<8x256xf32>
    %68 = vector.broadcast %59 : vector<8x1xf32> to vector<8x256xf32>
    %69 = arith.mulf %65, %68 : vector<8x256xf32>
    %70 = arith.addf %67, %69 : vector<8x256xf32>
    %71 = vector.broadcast %57 : vector<8x1xf32> to vector<8x256xf32>
    %72 = arith.mulf %70, %71 : vector<8x256xf32>
    %cst_9 = arith.constant 0.000000e+00 : f32
    %cst_10 = arith.constant 1.000000e+00 : f32
    %73 = vector.broadcast %cst_9 : f32 to vector<8x256xf32>
    %74 = arith.maximumf %73, %72 : vector<8x256xf32>
    %75 = vector.broadcast %cst_10 : f32 to vector<8x256xf32>
    %76 = arith.minimumf %75, %74 : vector<8x256xf32>
    %77 = vector.broadcast %58 : vector<8x1xf32> to vector<8x256xf32>
    %78 = arith.mulf %76, %77 : vector<8x256xf32>
    %79 = arith.subf %62, %78 : vector<8x256xf32>
    %80 = vector.broadcast %59 : vector<8x1xf32> to vector<8x256xf32>
    %81 = arith.mulf %76, %80 : vector<8x256xf32>
    %82 = arith.subf %65, %81 : vector<8x256xf32>
    %83 = arith.mulf %79, %79 : vector<8x256xf32>
    %84 = arith.mulf %82, %82 : vector<8x256xf32>
    %85 = arith.addf %83, %84 : vector<8x256xf32>
    %86 = vector.extract_strided_slice %6 {offsets = [0, 16], sizes = [8, 1], strides = [1, 1]} : vector<8x32xf32> to vector<8x1xf32>
    %87 = arith.subf %55, %53 : vector<8x1xf32>
    %88 = arith.subf %56, %54 : vector<8x1xf32>
    %89 = vector.broadcast %3 : vector<1x256xf32> to vector<8x256xf32>
    %90 = vector.broadcast %53 : vector<8x1xf32> to vector<8x256xf32>
    %91 = arith.subf %89, %90 : vector<8x256xf32>
    %92 = vector.broadcast %4 : vector<1x256xf32> to vector<8x256xf32>
    %93 = vector.broadcast %54 : vector<8x1xf32> to vector<8x256xf32>
    %94 = arith.subf %92, %93 : vector<8x256xf32>
    %95 = vector.broadcast %87 : vector<8x1xf32> to vector<8x256xf32>
    %96 = arith.mulf %91, %95 : vector<8x256xf32>
    %97 = vector.broadcast %88 : vector<8x1xf32> to vector<8x256xf32>
    %98 = arith.mulf %94, %97 : vector<8x256xf32>
    %99 = arith.addf %96, %98 : vector<8x256xf32>
    %100 = vector.broadcast %86 : vector<8x1xf32> to vector<8x256xf32>
    %101 = arith.mulf %99, %100 : vector<8x256xf32>
    %cst_11 = arith.constant 0.000000e+00 : f32
    %cst_12 = arith.constant 1.000000e+00 : f32
    %102 = vector.broadcast %cst_11 : f32 to vector<8x256xf32>
    %103 = arith.maximumf %102, %101 : vector<8x256xf32>
    %104 = vector.broadcast %cst_12 : f32 to vector<8x256xf32>
    %105 = arith.minimumf %104, %103 : vector<8x256xf32>
    %106 = vector.broadcast %87 : vector<8x1xf32> to vector<8x256xf32>
    %107 = arith.mulf %105, %106 : vector<8x256xf32>
    %108 = arith.subf %91, %107 : vector<8x256xf32>
    %109 = vector.broadcast %88 : vector<8x1xf32> to vector<8x256xf32>
    %110 = arith.mulf %105, %109 : vector<8x256xf32>
    %111 = arith.subf %94, %110 : vector<8x256xf32>
    %112 = arith.mulf %108, %108 : vector<8x256xf32>
    %113 = arith.mulf %111, %111 : vector<8x256xf32>
    %114 = arith.addf %112, %113 : vector<8x256xf32>
    %115 = vector.extract_strided_slice %6 {offsets = [0, 17], sizes = [8, 1], strides = [1, 1]} : vector<8x32xf32> to vector<8x1xf32>
    %116 = arith.subf %51, %55 : vector<8x1xf32>
    %117 = arith.subf %52, %56 : vector<8x1xf32>
    %118 = vector.broadcast %3 : vector<1x256xf32> to vector<8x256xf32>
    %119 = vector.broadcast %55 : vector<8x1xf32> to vector<8x256xf32>
    %120 = arith.subf %118, %119 : vector<8x256xf32>
    %121 = vector.broadcast %4 : vector<1x256xf32> to vector<8x256xf32>
    %122 = vector.broadcast %56 : vector<8x1xf32> to vector<8x256xf32>
    %123 = arith.subf %121, %122 : vector<8x256xf32>
    %124 = vector.broadcast %116 : vector<8x1xf32> to vector<8x256xf32>
    %125 = arith.mulf %120, %124 : vector<8x256xf32>
    %126 = vector.broadcast %117 : vector<8x1xf32> to vector<8x256xf32>
    %127 = arith.mulf %123, %126 : vector<8x256xf32>
    %128 = arith.addf %125, %127 : vector<8x256xf32>
    %129 = vector.broadcast %115 : vector<8x1xf32> to vector<8x256xf32>
    %130 = arith.mulf %128, %129 : vector<8x256xf32>
    %cst_13 = arith.constant 0.000000e+00 : f32
    %cst_14 = arith.constant 1.000000e+00 : f32
    %131 = vector.broadcast %cst_13 : f32 to vector<8x256xf32>
    %132 = arith.maximumf %131, %130 : vector<8x256xf32>
    %133 = vector.broadcast %cst_14 : f32 to vector<8x256xf32>
    %134 = arith.minimumf %133, %132 : vector<8x256xf32>
    %135 = vector.broadcast %116 : vector<8x1xf32> to vector<8x256xf32>
    %136 = arith.mulf %134, %135 : vector<8x256xf32>
    %137 = arith.subf %120, %136 : vector<8x256xf32>
    %138 = vector.broadcast %117 : vector<8x1xf32> to vector<8x256xf32>
    %139 = arith.mulf %134, %138 : vector<8x256xf32>
    %140 = arith.subf %123, %139 : vector<8x256xf32>
    %141 = arith.mulf %137, %137 : vector<8x256xf32>
    %142 = arith.mulf %140, %140 : vector<8x256xf32>
    %143 = arith.addf %141, %142 : vector<8x256xf32>
    %144 = arith.minimumf %114, %143 : vector<8x256xf32>
    %145 = arith.minimumf %85, %144 : vector<8x256xf32>
    %146 = vector.extract_strided_slice %6 {offsets = [0, 31], sizes = [8, 1], strides = [1, 1]} : vector<8x32xf32> to vector<8x1xf32>
    %cst_15 = arith.constant 5.000000e-01 : f32
    %147 = vector.broadcast %cst_15 : f32 to vector<8x1xf32>
    %148 = arith.cmpf ogt, %146, %147 : vector<8x1xf32>
    %149 = vector.extract_strided_slice %6 {offsets = [0, 30], sizes = [8, 1], strides = [1, 1]} : vector<8x32xf32> to vector<8x1xf32>
    %cst_16 = arith.constant 5.000000e-01 : f32
    %150 = vector.broadcast %cst_16 : f32 to vector<8x1xf32>
    %151 = arith.cmpf ogt, %149, %150 : vector<8x1xf32>
    %cst_17 = arith.constant 9.21024038E-5 : f32
    %152 = vector.broadcast %cst_17 : f32 to vector<8x256xf32>
    %153 = arith.cmpf olt, %145, %152 : vector<8x256xf32>
    %154 = arith.ori %50, %153 : vector<8x256xi1>
    %155 = vector.broadcast %148 : vector<8x1xi1> to vector<8x256xi1>
    %156 = arith.andi %154, %155 : vector<8x256xi1>
    %cst_18 = arith.constant 0.000000e+00 : f32
    %157 = vector.broadcast %cst_18 : f32 to vector<8x256xf32>
    %158 = arith.subf %157, %145 : vector<8x256xf32>
    %159 = arith.select %50, %158, %145 : vector<8x256xi1>, vector<8x256xf32>
    %cst_19 = arith.constant 1.000000e+05 : f32
    %160 = vector.broadcast %cst_19 : f32 to vector<8x256xf32>
    %161 = arith.mulf %159, %160 : vector<8x256xf32>
    %cst_20 = arith.constant 8.000000e+01 : f32
    %162 = vector.broadcast %cst_20 : f32 to vector<8x256xf32>
    %163 = arith.minimumf %161, %162 : vector<8x256xf32>
    %164 = math.exp %163 : vector<8x256xf32>
    %cst_21 = arith.constant 1.000000e+00 : f32
    %165 = vector.broadcast %cst_21 : f32 to vector<8x256xf32>
    %166 = arith.addf %165, %164 : vector<8x256xf32>
    %167 = tpu.reciprocal %166 {approx = true} : vector<8x256xf32> -> vector<8x256xf32>
    %c0_22 = arith.constant 0 : index
    %c0_23 = arith.constant 0 : index
    %168 = vector.load %arg10[%c0_22, %c0_23] : memref<8x256xf32, #tpu.memory_space<vmem>>, vector<8x256xf32>
    %cst_24 = arith.constant 1.000000e+00 : f32
    %169 = vector.broadcast %cst_24 : f32 to vector<8x256xf32>
    %170 = arith.subf %169, %167 : vector<8x256xf32>
    %cst_25 = arith.constant 1.000000e+00 : f32
    %171 = vector.broadcast %cst_25 : f32 to vector<8x256xf32>
    %172 = arith.select %156, %170, %171 : vector<8x256xi1>, vector<8x256xf32>
    %173 = arith.mulf %168, %172 : vector<8x256xf32>
    %c0_26 = arith.constant 0 : index
    %c0_27 = arith.constant 0 : index
    %174 = vector.load %arg10[%c0_26, %c0_27] : memref<8x256xf32, #tpu.memory_space<vmem>>, vector<8x256xf32>
    tpu.vector_store %arg10[%c0_26, %c0_27], %173 {strides = array<i32>} : memref<8x256xf32, #tpu.memory_space<vmem>>, vector<8x256xf32>,
    %cst_28 = arith.constant 0.000000e+00 : f32
    %cst_29 = arith.constant 1.000000e+00 : f32
    %175 = vector.broadcast %cst_28 : f32 to vector<8x256xf32>
    %176 = arith.maximumf %175, %18 : vector<8x256xf32>
    %177 = vector.broadcast %cst_29 : f32 to vector<8x256xf32>
    %178 = arith.minimumf %177, %176 : vector<8x256xf32>
    %cst_30 = arith.constant 0.000000e+00 : f32
    %cst_31 = arith.constant 1.000000e+00 : f32
    %179 = vector.broadcast %cst_30 : f32 to vector<8x256xf32>
    %180 = arith.maximumf %179, %30 : vector<8x256xf32>
    %181 = vector.broadcast %cst_31 : f32 to vector<8x256xf32>
    %182 = arith.minimumf %181, %180 : vector<8x256xf32>
    %cst_32 = arith.constant 0.000000e+00 : f32
    %cst_33 = arith.constant 1.000000e+00 : f32
    %183 = vector.broadcast %cst_32 : f32 to vector<8x256xf32>
    %184 = arith.maximumf %183, %42 : vector<8x256xf32>
    %185 = vector.broadcast %cst_33 : f32 to vector<8x256xf32>
    %186 = arith.minimumf %185, %184 : vector<8x256xf32>
    %187 = arith.addf %178, %182 : vector<8x256xf32>
    %188 = arith.addf %187, %186 : vector<8x256xf32>
    %cst_34 = arith.constant 9.99999974E-6 : f32
    %189 = vector.broadcast %cst_34 : f32 to vector<8x256xf32>
    %190 = arith.maximumf %188, %189 : vector<8x256xf32>
    %191 = tpu.reciprocal %190 {approx = true} : vector<8x256xf32> -> vector<8x256xf32>
    %192 = arith.mulf %178, %191 : vector<8x256xf32>
    %193 = arith.mulf %182, %191 : vector<8x256xf32>
    %194 = arith.mulf %186, %191 : vector<8x256xf32>
    %195 = vector.extract_strided_slice %6 {offsets = [0, 18], sizes = [8, 1], strides = [1, 1]} : vector<8x32xf32> to vector<8x1xf32>
    %196 = vector.broadcast %195 : vector<8x1xf32> to vector<8x256xf32>
    %197 = arith.mulf %192, %196 : vector<8x256xf32>
    %198 = vector.extract_strided_slice %6 {offsets = [0, 19], sizes = [8, 1], strides = [1, 1]} : vector<8x32xf32> to vector<8x1xf32>
    %199 = vector.broadcast %198 : vector<8x1xf32> to vector<8x256xf32>
    %200 = arith.mulf %193, %199 : vector<8x256xf32>
    %201 = arith.addf %197, %200 : vector<8x256xf32>
    %202 = vector.extract_strided_slice %6 {offsets = [0, 20], sizes = [8, 1], strides = [1, 1]} : vector<8x32xf32> to vector<8x1xf32>
    %203 = vector.broadcast %202 : vector<8x1xf32> to vector<8x256xf32>
    %204 = arith.mulf %194, %203 : vector<8x256xf32>
    %205 = arith.addf %201, %204 : vector<8x256xf32>
    %cst_35 = arith.constant 1.000000e-10 : f32
    %206 = vector.broadcast %cst_35 : f32 to vector<8x256xf32>
    %207 = arith.maximumf %205, %206 : vector<8x256xf32>
    %cst_36 = arith.constant 1.000000e+00 : f32
    %208 = vector.broadcast %cst_36 : f32 to vector<8x256xf32>
    %209 = arith.divf %208, %207 : vector<8x256xf32>
    %cst_37 = arith.constant 1.000000e+02 : f32
    %210 = vector.broadcast %cst_37 : f32 to vector<8x256xf32>
    %211 = arith.subf %210, %209 : vector<8x256xf32>
    %cst_38 = arith.constant 0.0101010101 : f32
    %212 = vector.broadcast %cst_38 : f32 to vector<8x256xf32>
    %213 = arith.mulf %211, %212 : vector<8x256xf32>
    %214 = vector.broadcast %151 : vector<8x1xi1> to vector<8x256xi1>
    %215 = arith.andi %156, %214 : vector<8x256xi1>
    %cst_39 = arith.constant 1.000000e+00 : f32
    %216 = vector.broadcast %cst_39 : f32 to vector<8x256xf32>
    %217 = arith.cmpf oge, %209, %216 : vector<8x256xf32>
    %218 = arith.andi %215, %217 : vector<8x256xi1>
    %cst_40 = arith.constant 1.000000e+02 : f32
    %219 = vector.broadcast %cst_40 : f32 to vector<8x256xf32>
    %220 = arith.cmpf ole, %209, %219 : vector<8x256xf32>
    %221 = arith.andi %218, %220 : vector<8x256xi1>
    %cst_41 = arith.constant 0xFF800000 : f32
    %222 = vector.broadcast %cst_41 : f32 to vector<8x256xf32>
    %223 = arith.select %221, %213, %222 : vector<8x256xi1>, vector<8x256xf32>
    %cst_42 = arith.constant dense<0xFF800000> : vector<256xf32>
    %224 = vector.multi_reduction <maximumf>, %223, %cst_42 [0] : vector<8x256xf32> to vector<256xf32>
    %225 = vector.shape_cast %224 : vector<256xf32> to vector<1x256xf32>
    %c0_43 = arith.constant 0 : index
    %c0_44 = arith.constant 0 : index
    %226 = vector.load %arg7[%c0_43, %c0_44] : memref<1x256xf32, #tpu.memory_space<vmem>>, vector<1x256xf32>
    %227 = arith.maximumf %226, %225 : vector<1x256xf32>
    %228 = arith.subf %226, %227 : vector<1x256xf32>
    %cst_45 = arith.constant 1.000000e+04 : f32
    %229 = vector.broadcast %cst_45 : f32 to vector<1x256xf32>
    %230 = arith.mulf %228, %229 : vector<1x256xf32>
    %231 = math.exp %230 : vector<1x256xf32>
    %232 = vector.broadcast %227 : vector<1x256xf32> to vector<8x256xf32>
    %233 = arith.subf %223, %232 : vector<8x256xf32>
    %cst_46 = arith.constant 1.000000e+04 : f32
    %234 = vector.broadcast %cst_46 : f32 to vector<8x256xf32>
    %235 = arith.mulf %233, %234 : vector<8x256xf32>
    %236 = math.exp %235 : vector<8x256xf32>
    %237 = arith.mulf %236, %167 : vector<8x256xf32>
    %c0_47 = arith.constant 0 : index
    %c0_48 = arith.constant 0 : index
    %238 = vector.load %arg8[%c0_47, %c0_48] : memref<1x256xf32, #tpu.memory_space<vmem>>, vector<1x256xf32>
    %239 = arith.mulf %238, %231 : vector<1x256xf32>
    %cst_49 = arith.constant dense<0.000000e+00> : vector<256xf32>
    %240 = vector.multi_reduction <add>, %237, %cst_49 [0] : vector<8x256xf32> to vector<256xf32>
    %241 = vector.shape_cast %240 : vector<256xf32> to vector<1x256xf32>
    %242 = arith.addf %239, %241 : vector<1x256xf32>
    %c0_50 = arith.constant 0 : index
    %c0_51 = arith.constant 0 : index
    %243 = vector.load %arg8[%c0_50, %c0_51] : memref<1x256xf32, #tpu.memory_space<vmem>>, vector<1x256xf32>
    tpu.vector_store %arg8[%c0_50, %c0_51], %242 {strides = array<i32>} : memref<1x256xf32, #tpu.memory_space<vmem>>, vector<1x256xf32>,
    %244 = vector.extract_strided_slice %6 {offsets = [0, 21], sizes = [8, 1], strides = [1, 1]} : vector<8x32xf32> to vector<8x1xf32>
    %245 = vector.broadcast %244 : vector<8x1xf32> to vector<8x256xf32>
    %246 = arith.mulf %192, %245 : vector<8x256xf32>
    %247 = vector.extract_strided_slice %6 {offsets = [0, 24], sizes = [8, 1], strides = [1, 1]} : vector<8x32xf32> to vector<8x1xf32>
    %248 = vector.broadcast %247 : vector<8x1xf32> to vector<8x256xf32>
    %249 = arith.mulf %193, %248 : vector<8x256xf32>
    %250 = arith.addf %246, %249 : vector<8x256xf32>
    %251 = vector.extract_strided_slice %6 {offsets = [0, 27], sizes = [8, 1], strides = [1, 1]} : vector<8x32xf32> to vector<8x1xf32>
    %252 = vector.broadcast %251 : vector<8x1xf32> to vector<8x256xf32>
    %253 = arith.mulf %194, %252 : vector<8x256xf32>
    %254 = arith.addf %250, %253 : vector<8x256xf32>
    %255 = arith.mulf %237, %254 : vector<8x256xf32>
    %cst_52 = arith.constant dense<0.000000e+00> : vector<256xf32>
    %256 = vector.multi_reduction <add>, %255, %cst_52 [0] : vector<8x256xf32> to vector<256xf32>
    %257 = vector.shape_cast %256 : vector<256xf32> to vector<1x256xf32>
    %258 = vector.extract_strided_slice %6 {offsets = [0, 22], sizes = [8, 1], strides = [1, 1]} : vector<8x32xf32> to vector<8x1xf32>
    %259 = vector.broadcast %258 : vector<8x1xf32> to vector<8x256xf32>
    %260 = arith.mulf %192, %259 : vector<8x256xf32>
    %261 = vector.extract_strided_slice %6 {offsets = [0, 25], sizes = [8, 1], strides = [1, 1]} : vector<8x32xf32> to vector<8x1xf32>
    %262 = vector.broadcast %261 : vector<8x1xf32> to vector<8x256xf32>
    %263 = arith.mulf %193, %262 : vector<8x256xf32>
    %264 = arith.addf %260, %263 : vector<8x256xf32>
    %265 = vector.extract_strided_slice %6 {offsets = [0, 28], sizes = [8, 1], strides = [1, 1]} : vector<8x32xf32> to vector<8x1xf32>
    %266 = vector.broadcast %265 : vector<8x1xf32> to vector<8x256xf32>
    %267 = arith.mulf %194, %266 : vector<8x256xf32>
    %268 = arith.addf %264, %267 : vector<8x256xf32>
    %269 = arith.mulf %237, %268 : vector<8x256xf32>
    %cst_53 = arith.constant dense<0.000000e+00> : vector<256xf32>
    %270 = vector.multi_reduction <add>, %269, %cst_53 [0] : vector<8x256xf32> to vector<256xf32>
    %271 = vector.shape_cast %270 : vector<256xf32> to vector<1x256xf32>
    %272 = vector.extract_strided_slice %6 {offsets = [0, 23], sizes = [8, 1], strides = [1, 1]} : vector<8x32xf32> to vector<8x1xf32>
    %273 = vector.broadcast %272 : vector<8x1xf32> to vector<8x256xf32>
    %274 = arith.mulf %192, %273 : vector<8x256xf32>
    %275 = vector.extract_strided_slice %6 {offsets = [0, 26], sizes = [8, 1], strides = [1, 1]} : vector<8x32xf32> to vector<8x1xf32>
    %276 = vector.broadcast %275 : vector<8x1xf32> to vector<8x256xf32>
    %277 = arith.mulf %193, %276 : vector<8x256xf32>
    %278 = arith.addf %274, %277 : vector<8x256xf32>
    %279 = vector.extract_strided_slice %6 {offsets = [0, 29], sizes = [8, 1], strides = [1, 1]} : vector<8x32xf32> to vector<8x1xf32>
    %280 = vector.broadcast %279 : vector<8x1xf32> to vector<8x256xf32>
    %281 = arith.mulf %194, %280 : vector<8x256xf32>
    %282 = arith.addf %278, %281 : vector<8x256xf32>
    %283 = arith.mulf %237, %282 : vector<8x256xf32>
    %cst_54 = arith.constant dense<0.000000e+00> : vector<256xf32>
    %284 = vector.multi_reduction <add>, %283, %cst_54 [0] : vector<8x256xf32> to vector<256xf32>
    %285 = vector.shape_cast %284 : vector<256xf32> to vector<1x256xf32>
    %c0_55 = arith.constant 0 : index
    %c0_56 = arith.constant 0 : index
    %286 = vector.load %arg9[%c0_55, %c0_56] : memref<3x256xf32, #tpu.memory_space<vmem>>, vector<3x256xf32>
    %287 = vector.broadcast %231 : vector<1x256xf32> to vector<3x256xf32>
    %288 = arith.mulf %286, %287 : vector<3x256xf32>
    %289 = tpu.concatenate %257, %271, %285 in 0 : vector<1x256xf32>, vector<1x256xf32>, vector<1x256xf32> -> vector<3x256xf32>
    %290 = arith.addf %288, %289 : vector<3x256xf32>
    %c0_57 = arith.constant 0 : index
    %c0_58 = arith.constant 0 : index
    %291 = vector.load %arg9[%c0_57, %c0_58] : memref<3x256xf32, #tpu.memory_space<vmem>>, vector<3x256xf32>
    tpu.vector_store %arg9[%c0_57, %c0_58], %290 {strides = array<i32>} : memref<3x256xf32, #tpu.memory_space<vmem>>, vector<3x256xf32>,
    %c0_59 = arith.constant 0 : index
    %c0_60 = arith.constant 0 : index
    %292 = vector.load %arg7[%c0_59, %c0_60] : memref<1x256xf32, #tpu.memory_space<vmem>>, vector<1x256xf32>
    tpu.vector_store %arg7[%c0_59, %c0_60], %227 {strides = array<i32>} : memref<1x256xf32, #tpu.memory_space<vmem>>, vector<1x256xf32>,
    %c0_i32_61 = arith.constant 0 : i32
    %293 = arith.cmpi eq, %arg2, %c0_i32_61 : i32
    %294 = arith.extui %293 : i1 to i32
    %c0_i32_62 = arith.constant 0 : i32
    %295 = arith.cmpi ne, %294, %c0_i32_62 : i32
    scf.if %295 {
      %c0_63 = arith.constant 0 : index
      %c0_64 = arith.constant 0 : index
      %296 = vector.load %arg7[%c0_63, %c0_64] : memref<1x256xf32, #tpu.memory_space<vmem>>, vector<1x256xf32>
      %cst_65 = arith.constant 1.000000e-03 : f32
      %297 = vector.broadcast %cst_65 : f32 to vector<1x256xf32>
      %298 = arith.subf %297, %296 : vector<1x256xf32>
      %cst_66 = arith.constant 1.000000e+04 : f32
      %299 = vector.broadcast %cst_66 : f32 to vector<1x256xf32>
      %300 = arith.mulf %298, %299 : vector<1x256xf32>
      %301 = math.exp %300 : vector<1x256xf32>
      %c0_67 = arith.constant 0 : index
      %c0_68 = arith.constant 0 : index
      %302 = vector.load %arg8[%c0_67, %c0_68] : memref<1x256xf32, #tpu.memory_space<vmem>>, vector<1x256xf32>
      %303 = arith.addf %301, %302 : vector<1x256xf32>
      %cst_69 = arith.constant 1.000000e+00 : f32
      %304 = vector.broadcast %cst_69 : f32 to vector<1x256xf32>
      %305 = arith.divf %304, %303 : vector<1x256xf32>
      %c0_70 = arith.constant 0 : index
      %c0_71 = arith.constant 0 : index
      %306 = vector.load %arg9[%c0_70, %c0_71] : memref<3x256xf32, #tpu.memory_space<vmem>>, vector<3x256xf32>
      %307 = vector.extract_strided_slice %306 {offsets = [0, 0], sizes = [1, 256], strides = [1, 1]} : vector<3x256xf32> to vector<1x256xf32>
      %cst_72 = arith.constant 0.000000e+00 : f32
      %308 = vector.broadcast %cst_72 : f32 to vector<1x256xf32>
      %309 = arith.mulf %301, %308 : vector<1x256xf32>
      %310 = arith.addf %307, %309 : vector<1x256xf32>
      %311 = arith.mulf %310, %305 : vector<1x256xf32>
      %312 = vector.extract_strided_slice %306 {offsets = [1, 0], sizes = [1, 256], strides = [1, 1]} : vector<3x256xf32> to vector<1x256xf32>
      %cst_73 = arith.constant 0.000000e+00 : f32
      %313 = vector.broadcast %cst_73 : f32 to vector<1x256xf32>
      %314 = arith.mulf %301, %313 : vector<1x256xf32>
      %315 = arith.addf %312, %314 : vector<1x256xf32>
      %316 = arith.mulf %315, %305 : vector<1x256xf32>
      %317 = vector.extract_strided_slice %306 {offsets = [2, 0], sizes = [1, 256], strides = [1, 1]} : vector<3x256xf32> to vector<1x256xf32>
      %cst_74 = arith.constant 0.000000e+00 : f32
      %318 = vector.broadcast %cst_74 : f32 to vector<1x256xf32>
      %319 = arith.mulf %301, %318 : vector<1x256xf32>
      %320 = arith.addf %317, %319 : vector<1x256xf32>
      %321 = arith.mulf %320, %305 : vector<1x256xf32>
      %c0_75 = arith.constant 0 : index
      %c0_76 = arith.constant 0 : index
      %322 = vector.load %arg10[%c0_75, %c0_76] : memref<8x256xf32, #tpu.memory_space<vmem>>, vector<8x256xf32>
      %323 = vector.extract_strided_slice %322 {offsets = [0, 0], sizes = [4, 256], strides = [1, 1]} : vector<8x256xf32> to vector<4x256xf32>
      %324 = vector.extract_strided_slice %322 {offsets = [4, 0], sizes = [4, 256], strides = [1, 1]} : vector<8x256xf32> to vector<4x256xf32>
      %325 = arith.mulf %323, %324 : vector<4x256xf32>
      %326 = vector.extract_strided_slice %325 {offsets = [0, 0], sizes = [2, 256], strides = [1, 1]} : vector<4x256xf32> to vector<2x256xf32>
      %327 = vector.extract_strided_slice %325 {offsets = [2, 0], sizes = [2, 256], strides = [1, 1]} : vector<4x256xf32> to vector<2x256xf32>
      %328 = arith.mulf %326, %327 : vector<2x256xf32>
      %329 = vector.extract_strided_slice %328 {offsets = [0, 0], sizes = [1, 256], strides = [1, 1]} : vector<2x256xf32> to vector<1x256xf32>
      %330 = vector.extract_strided_slice %328 {offsets = [1, 0], sizes = [1, 256], strides = [1, 1]} : vector<2x256xf32> to vector<1x256xf32>
      %331 = arith.mulf %329, %330 : vector<1x256xf32>
      %cst_77 = arith.constant 1.000000e+00 : f32
      %332 = vector.broadcast %cst_77 : f32 to vector<1x256xf32>
      %333 = arith.subf %332, %331 : vector<1x256xf32>
      %cst_78 = arith.constant 0.000000e+00 : f32
      %cst_79 = arith.constant 1.000000e+00 : f32
      %334 = vector.broadcast %cst_78 : f32 to vector<1x256xf32>
      %335 = arith.maximumf %334, %333 : vector<1x256xf32>
      %336 = vector.broadcast %cst_79 : f32 to vector<1x256xf32>
      %337 = arith.minimumf %336, %335 : vector<1x256xf32>
      %338 = tpu.concatenate %311, %316, %321, %337 in 0 : vector<1x256xf32>, vector<1x256xf32>, vector<1x256xf32>, vector<1x256xf32> -> vector<4x256xf32>
      %c0_80 = arith.constant 0 : index
      %c0_81 = arith.constant 0 : index
      %c0_82 = arith.constant 0 : index
      %339 = vector.load %arg6[%c0_80, %c0_81, %c0_82] : memref<1x4x256xf32, #tpu.memory_space<vmem>>, vector<1x4x256xf32>
      %340 = vector.shape_cast %339 : vector<1x4x256xf32> to vector<4x256xf32>
      %341 = vector.shape_cast %338 : vector<4x256xf32> to vector<1x4x256xf32>
      tpu.vector_store %arg6[%c0_80, %c0_81, %c0_82], %341 {strides = array<i32>} : memref<1x4x256xf32, #tpu.memory_space<vmem>>, vector<1x4x256xf32>,
    } else {
    }
    return
  }
  func.func @transform_0(%arg0: i32, %arg1: i32, %arg2: i32) -> (i32, i32) {
    %c0_i32 = arith.constant 0 : i32
    %c0_i32_0 = arith.constant 0 : i32
    return %c0_i32, %arg1 : i32, i32
  }
  func.func @transform_1(%arg0: i32, %arg1: i32, %arg2: i32) -> (i32, i32) {
    %c0_i32 = arith.constant 0 : i32
    %c0_i32_0 = arith.constant 0 : i32
    return %c0_i32, %arg1 : i32, i32
  }
  func.func @transform_2(%arg0: i32, %arg1: i32, %arg2: i32) -> (i32, i32, i32) {
    %c0_i32 = arith.constant 0 : i32
    %c0_i32_0 = arith.constant 0 : i32
    return %arg0, %arg2, %c0_i32 : i32, i32, i32
  }
  func.func @transform_3(%arg0: i32, %arg1: i32, %arg2: i32) -> (i32, i32, i32) {
    %c0_i32 = arith.constant 0 : i32
    %c0_i32_0 = arith.constant 0 : i32
    return %arg0, %c0_i32, %arg1 : i32, i32, i32
  }
}

</mosaic_0001>

<bundles_post_ra>
// kernel: tpu_custom_call.1
= control target key start
LH: loop header
LB: loop body
LE: loop exit
PB: predicated region body
PF: predicated region fallthrough
CT: control target
= control target key end

     0   :  { %8 = vsyncpa [#allocation7], 0  ;;  %s2043_s0 = inlined_call_operand.hbm [shape: f32[1,256], index: 0, kind: input, shape index: {}]   ;;  %s2044_s1 = inlined_call_operand.hbm [shape: f32[1,256], index: 1, kind: input, shape index: {}]   ;;  %s2045_s2 = inlined_call_operand.hbm [shape: f32[2,8,32], index: 2, kind: input, shape index: {}]   ;;  %s2046_s3 = inlined_call_operand.hbm [shape: f32[2,4,256], index: 3, kind: output, shape index: {}]  }
   0x1   :  { %9 = vsyncpa [#allocation10], 0 }
   0x2   :  { %10 = vsyncpa [#allocation8], 0 }
   0x3   :  { %12 = vsyncpa [#allocation8 + $0x1], 0  ;;  %s1526_s12 = smov 0   ;;  %s1528_s13 = smov 0  }
   0x4   :  { %s1530_s14 = smov 0   ;;  %s1532_s15 = smov 0  }
   0x5   :  { %s1534_s16 = smov 0   ;;  %s1536_s17 = smov 0  }
   0x6 LB: > { %s1557_s18 = sadd.s32 4294967295, %s1465_s17   ;;  %s1082_s19 = sadd.s32 4294967294, %s1465_s17   ;;  %s1465_s17 = sphi %s1536_s17, %s18_s17   ;;  %s1461_s16 = sphi %s1534_s16, %s2072_s16   ;;  %s1457_s15 = sphi %s1532_s15, %s2071_s15   ;;  %s1453_s14 = sphi %s1530_s14, %s2070_s14   ;;  %s1449_s13 = sphi %s1528_s13, %s2069_s13   ;;  %s1445_s12 = sphi %s1526_s12, %s2068_s12  }
   0x7   : > { %p111_p0 = scmp.ne.s32.totalorder %s1449_s13, %s1445_s12  ;;  %p112_p1 = scmp.eq.s32.totalorder %s1557_s18, 0 }
   0x8   : > { %p137_p2 = scmp.eq.s32.totalorder %s1557_s18, 1  ;;  %p143_p3 = scmp.eq.s32.totalorder %s1082_s19, 1 }
   0x9   : > { %p1566_p4 = por %p112_p1, %p111_p0  ;;  %p1083_p5 = scmp.ge.s32.totalorder %s1465_s17, 1 }
   0xa   : > { %p1571_p6 = por %p143_p3, %p111_p0  ;;  %p150_p7 = scmp.lt.s32.totalorder %s1465_s17, 3 }
   0xb   : > { %s164_s24 = sshll.u32 %s2043_s0, 4  ;;  %p1086_p9 = scmp.ge.s32.totalorder %s1465_s17, 2  ;;  %s165_s24 = int_to_ptr.hbm [resolvable:$true] %s164_s24 }
   0xc   : > { %p1579_p8 = pnand %p1083_p5, %p150_p7  ;;  %s1467_s26 = smov [#allocation6]  }
   0xd   : > { %s166_s27 = sshll.u32 %s1467_s26, 4  ;;  %s178_s30 = sshll.u32 %s2044_s1, 4  ;;  %s167_s27 = int_to_ptr.vmem [resolvable:$true] %s166_s27  ;;  %s179_s30 = int_to_ptr.hbm [resolvable:$true] %s178_s30 }
   0xe   : > { %p1112_p10 = pneg %p1579_p8  ;;  %s1468_s4 = smov [#allocation9]  }
   0xf   : > { %s180_s5 = sshll.u32 %s1468_s4, 4  ;;  %s37_s6 = sadd.s32 1, %s1461_s16  ;;  %s181_s5 = int_to_ptr.vmem [resolvable:$true] %s180_s5 }
  0x10   : > { %p1113_p11 = pnand %p1112_p10, %p112_p1  ;;  %s98_s7 = sadd.s32 1, %s1453_s14 }
  0x11   : > { %p39_p12 = scmp.ge.s32.totalorder %s37_s6, 2  ;;  %p105_p13 = scmp.ne.s32.totalorder %s1453_s14, %s1449_s13 }
  0x12   : > { %1115 = dma.hbm_to_vmem [thread:$0]  (!%p1113_p11), %s165_s24, 32, %s167_s27, [#allocation7]  }
  0x13   : > { %1118 = dma.hbm_to_vmem [thread:$0]  (!%p1113_p11), %s179_s30, 32, %s181_s5, [#allocation10]  }
  0x14   : > { %p106_p0 = scmp.eq.s32.totalorder %s1465_s17, 0  ;;  %p1129_p3 = scmp.lt.s32.totalorder %s1465_s17, 2 }
  0x15   : > { %s2074_s6 = smov (%p39_p12, %s37_s6), 0  ;;  %p1605_p7 = por %p137_p2, %p105_p13 }
  0x16   : > { %p1599_p5 = por %p106_p0, %p105_p13  ;;  %s93_s10 = ssub.s32 %s1461_s16, %s2074_s6 }
  0x17   : > { %s191_s11 = sand.u32 1, %s1465_s17   ;;  %p96_p10 = scmp.eq.s32.totalorder %s93_s10, 0 }
  0x18   : > { %s193_s19 = sand.u32 1, %s1453_s14   ;;  %s1088_s22 = sshll.u32 %s1461_s16, 3 }
  0x19   : > { %s1615_s23 = scalar_select %p96_p10, %s1453_s14, %s98_s7  }
  0x1a   : > { %s1087_s24 = sshll.u32 %s193_s19, 3  ;;  %s200_s28 = scalar_lea.hbm %s2045_s2, %s1088_s22 }
  0x1b   : > { %s202_s29 = sshll.u32 %s200_s28, 4  ;;  %s195_s30 = scalar_lea.vmem [#allocation11], %s1087_s24  ;;  %s203_s29 = int_to_ptr.hbm [resolvable:$true] %s202_s29 }
  0x1c   : > { %s204_s4 = sshll.u32 %s195_s30, 4  ;;  %p1120_p2 = pnand %p1129_p3, %p1599_p5  ;;  %s205_s4 = int_to_ptr.vmem [resolvable:$true] %s204_s4 }
  0x1d   : > { %s192_s5 = scalar_lea.sflag [#allocation7], %s191_s11  ;;  %213 = sbr.rel (%p1579_p8) target bundleno = 435 (0x1b3), region = 32 }
  0x1e   : > { %1122 = dma.hbm_to_vmem [thread:$0]  (!%p1120_p2), %s203_s29, 128, %s205_s4, %s192_s5  }
  0x22   : > { %1428 = dma.done.wait (%p112_p1), [#allocation7], 32  }
  0x23   : > { %1430 = vsyncadd (%p112_p1), [#allocation7], 4294967264 }
  0x24   : > { %1432 = dma.done.wait (%p112_p1), [#allocation10], 32  }
  0x25   : > { %1434 = vsyncadd (%p112_p1), [#allocation10], 4294967264  ;;  %s225_s7 = sand.u32 1, %s1557_s18   ;;  %s227_s8 = sand.u32 1, %s1449_s13  }
  0x26   : > { %s1638_s25 = sshll.u32 %s227_s8, 3  ;;  %s226_s10 = scalar_lea.sflag [#allocation7], %s225_s7 }
  0x27   : > { %s229_s11 = scalar_lea.vmem [#allocation11], %s1638_s25 }
  0x28   : > { %1436 = dma.done.wait (%p1566_p4), %s226_s10, 128  }
  0x29   : > { %1438 = vsyncadd (%p1566_p4), %s226_s10, 4294967168  ;;  %v1469_v0 = vmov 2   ;;  %v1470_v1 = vmov 0   ;;  %v1471_v2 = vmov 4   ;;  %v1646_v3 = vld [vmem:[%s229_s11] sm:$0xff]  ;;  %v1472_v4 = vmov 3  }
  0x2a   : > { %1222 = vset.pattern.permute.xlu1 %v1469_v0  ;;  %1220 = vset.pattern.permute.xlu0 %v1470_v1  ;;  %v1473_v5 = vmov 1   ;;  %v1474_v6 = vmov 5   ;;  %s1475_s18 = smov 2   ;;  %v1476_v7 = vmov 6   ;;  %v1477_v8 = vmov 7   ;;  %s1478_s20 = smov 124  }
  0x2b   : > { %1224 = vset.pattern.permute.xlu2 %v1471_v2  ;;  %298 = vperm.xlu1 %1222, %v1646_v3   ;;  %v1479_v9 = vmov 8   ;;  %v1480_v10 = vmov 18   ;;  %v1481_v11 = vmov 9   ;;  %v1482_v12 = vmov 11   ;;  %v269_v22 = vld [vmem:[#allocation6] sm:$0x3] }
  0x2c   : > { %274 = vperm.xlu0 %1220, %v1646_v3   ;;  %310 = vperm.xlu2 %1224, %v1646_v3   ;;  %v1483_v13 = vmov 10   ;;  %v1484_v14 = vmov 13   ;;  %v1485_v15 = vmov 19   ;;  %v1486_v16 = vmov 20   ;;  %v270_v23 = vld [vmem:[#allocation9] sm:$0x3] }
  0x2d   : > { %v1487_v17 = vmov 12   ;;  %v1488_v18 = vmov 14   ;;  %v1671_v24 = vperm.slane %v269_v22, 0  ;;  %v1673_v25 = vperm.slane %v269_v22, 1  ;;  %s1099_s19 = sshll.u32 %s1457_s15, 3  ;;  %s252_s15 = scalar_lea.vmem [#allocation12], %s1638_s25 }
  0x2e   : > { %v1675_v26 = vperm.slane %v270_v23, 0  ;;  %v1677_v27 = vperm.slane %v270_v23, 1  ;;  %vm517_vm6 = vcmp.gt.f32.partialorder %v1646_v3, 0.5  ;;  %v1490_v22 = vmov 31   ;;  %s968_s26 = scalar_lea.hbm %s2046_s3, %s1099_s19  ;;  %s970_s27 = sshll.u32 %s252_s15, 4  ;;  %s971_s27 = int_to_ptr.vmem [resolvable:$true] %s970_s27 }
  0x2f   : > { %s972_s28 = sshll.u32 %s968_s26, 4  ;;  %s955_s29 = scalar_lea.sflag [#allocation8], %s227_s8  ;;  %s973_s28 = int_to_ptr.hbm [resolvable:$true] %s972_s28 }
  0x30   : > { %s1389_s30 = sshra.s32 %s973_s28, 4  ;;  %s1395_s25 = scalar_lea.hbm %s2046_s3, 16  ;;  %s1390_s30 = int_to_ptr.hbm [resolvable:$true] %s1389_s30 }
  0x31   : > { %s1391_s4 = scalar_lea.hbm %s1390_s30, 8  ;;  %p1396_p11 = scmp.lt.s32.totalorder %s1390_s30, %s2046_s3 }
  0x32   : > { %p1392_p1 = scmp.ne.s32.totalorder %s1390_s30, %s1391_s4  ;;  %p1397_p12 = scmp.lt.s32.totalorder %s1395_s25, %s1391_s4 }
  0x33   : > { %1223 = vset.pattern.permute.xlu1 %v1472_v4 }
  0x34   : > { %1221 = vset.pattern.permute.xlu0 %v1473_v5  ;;  %304 = vperm.xlu1 %1223, %v1646_v3   ;;  %p1393_p4 = pnand %p1392_p1, %p1605_p7  ;;  %p1398_p13 = por %p1397_p12, %p1396_p11 }
  0x35   : > { %285 = vperm.xlu0 %1221, %v1646_v3   ;;  %1225 = vset.pattern.permute.xlu2 %v1474_v6 }
  0x36   : > { %318 = vperm.xlu2 %1225, %v1646_v3   ;;  %p1394_p8 = pneg %p1393_p4 }
  0x38   : > { %p1399_p0 = pnand %p1398_p13, %p1394_p8 }
  0x3c   : > { %353 = vrot.lane.b32.xlu1 %v1646_v3, %s1475_s18 }
  0x3d   : > { %1226 = vset.pattern.permute.xlu0 %v1476_v7  ;;  %1227 = vset.pattern.permute.xlu1 %v1477_v8  ;;  %v1489_v8 = vmov 16  }
  0x3e   : > { %324 = vperm.xlu0 %1226, %v1646_v3   ;;  %458 = vrot.lane.b32.xlu2 %v1646_v3, %s1478_s20 }
  0x3f   : > { %1228 = vset.pattern.permute.xlu2 %v1479_v9 }
  0x44   : > { %330 = vperm.xlu1 %1227, %v1646_v3  }
  0x46   : > { %1235 = vset.pattern.permute.xlu0 %v1480_v10  ;;  %338 = vperm.xlu2 %1228, %v1646_v3  }
  0x47   : > { %582 = vperm.xlu0 %1235, %v1646_v3  }
  0x4c   : > { %1229 = vset.pattern.permute.xlu1 %v1481_v11 }
  0x4d   : > { %358 = vperm.xlu1 %1229, %v1646_v3  }
  0x4e   : > { %1230 = vset.pattern.permute.xlu2 %v1483_v13 }
  0x4f   : > { %1238 = vset.pattern.permute.xlu0 %v1482_v12  ;;  %364 = vperm.xlu2 %1230, %v1646_v3  }
  0x55   : > { %1231 = vset.pattern.permute.xlu1 %v1482_v12 }
  0x56   : > { %409 = vperm.xlu1 %1231, %v1646_v3  }
  0x57   : > { %1232 = vset.pattern.permute.xlu2 %v1487_v17 }
  0x58   : > { %415 = vperm.xlu2 %1232, %v1646_v3  }
  0x5e   : > { %1233 = vset.pattern.permute.xlu1 %v1484_v14 }
  0x5f   : > { %463 = vperm.xlu1 %1233, %v1646_v3  }
  0x60   : > { %1234 = vset.pattern.permute.xlu2 %v1488_v18 }
  0x61   : > { %469 = vperm.xlu2 %1234, %v1646_v3  }
  0x67   : > { %1236 = vset.pattern.permute.xlu1 %v1485_v15 }
  0x68   : > { %588 = vperm.xlu1 %1236, %v1646_v3  }
  0x69   : > { %1239 = vset.pattern.permute.xlu2 %v1484_v14 }
  0x70   : > { %1237 = vset.pattern.permute.xlu1 %v1486_v16 }
  0x71   : > { %596 = vperm.xlu1 %1237, %v1646_v3  }
  0x79   : > { %1240 = vset.pattern.permute.xlu1 %v1488_v18 }
  0x86   : > { %v311_v19 = vpop.permute.xlu2 %310 }
  0x87   : > { %v313_v31 = vmul.f32 %v311_v19, %v1675_v26  ;;  %v314_v32 = vmul.f32 %v311_v19, %v1677_v27 }
  0x90   : > { %v319_v28 = vpop.permute.xlu2 %318 }
  0x98   : > { %v459_v52 = vpop.permute.xlu2 %458 }
  0x99   : > { %v461_v4 = vsub.f32 %v1646_v3, %v459_v52  ;;  %v1500_v52 = vmov 26  }
  0x9d   : > { %v299_v20 = vpop.permute.xlu1 %298 }
  0x9e   : > { %v275_v21 = vpop.permute.xlu0 %274 }
  0x9f   : > { %v282_v29 = vmul.f32 %v1671_v24, %v275_v21  ;;  %v283_v30 = vmul.f32 %v1673_v25, %v275_v21  ;;  %v522_v21 = vsel %vm517_vm6, 1, %v1470_v1  ;;  %v1493_v1 = vmov 22  }
  0xa0   : > { %v339_v7 = vpop.permute.xlu2 %338 }
  0xa6   : > { %v305_v33 = vpop.permute.xlu1 %304 }
  0xa7   : > { %v286_v34 = vpop.permute.xlu0 %285  ;;  %v307_v35 = vmul.f32 %v305_v33, %v1671_v24  ;;  %v308_v36 = vmul.f32 %v305_v33, %v1673_v25  ;;  %v1492_v33 = vmov 17  }
  0xa8   : > { %v293_v37 = vmul.f32 %v1675_v26, %v286_v34  ;;  %v294_v38 = vmul.f32 %v1677_v27, %v286_v34 }
  0xa9   : > { %v315_v41 = vadd.f32 %v313_v31, %v307_v35  ;;  %v316_v42 = vadd.f32 %v314_v32, %v308_v36 }
  0xaa   : > { %v295_v39 = vadd.f32 %v293_v37, %v282_v29  ;;  %v296_v40 = vadd.f32 %v294_v38, %v283_v30  ;;  %v1491_v29 = vmov 15  }
  0xab   : > { %v321_v45 = vadd.f32 %v319_v28, %v315_v41  ;;  %v322_v46 = vadd.f32 %v319_v28, %v316_v42  ;;  %v1497_v41 = vmov 25  }
  0xac   : > { %v301_v43 = vadd.f32 %v299_v20, %v295_v39  ;;  %v302_v44 = vadd.f32 %v299_v20, %v296_v40  ;;  %v1495_v39 = vmov 30   ;;  %v1496_v40 = vmov 28  }
  0xad   : > { %vm345_vm0 = vcmp.gt.f32.partialorder %v321_v45, 0.0  ;;  %vm346_vm1 = vcmp.gt.f32.partialorder %v322_v46, 0.0  ;;  %v559_v49 = vmax.f32 %v321_v45, 0.0  ;;  %v560_v50 = vmax.f32 %v322_v46, 0.0 }
  0xae   : > { %v555_v47 = vmax.f32 %v301_v43, 0.0  ;;  %v556_v48 = vmax.f32 %v302_v44, 0.0  ;;  %v354_v51 = vpop.permute.xlu1 %353  ;;  %vm343_vm2 = vcmp.gt.f32.partialorder %v301_v43, 0.0  ;;  %vm344_vm3 = vcmp.gt.f32.partialorder %v302_v44, 0.0 }
  0xaf   : > { %v356_v55 = vsub.f32 %v1646_v3, %v354_v51  ;;  %vm1690_vm4 = vmand %vm343_vm2, %vm345_vm0  ;;  %v561_v57 = vmin.f32 %v559_v49, 1.0  ;;  %v562_v58 = vmin.f32 %v560_v50, 1.0  ;;  %v1498_v50 = vmov 24  }
  0xb0   : > { %v557_v53 = vmin.f32 %v555_v47, 1.0  ;;  %v1687_v54 = vmin.f32 %v556_v48, 1.0  ;;  %vm1694_vm5 = vmand %vm344_vm3, %vm346_vm1  ;;  %v325_v62 = vpop.permute.xlu0 %324  ;;  %v1499_v51 = vmov 29  }
  0xb1   : > { %427 = vperm.xlu1 %1240, %v356_v55   ;;  %421 = vperm.xlu2 %1239, %v356_v55   ;;  %v327_v63 = vmul.f32 %v325_v62, %v1671_v24  ;;  %v328_v0 = vmul.f32 %v325_v62, %v1673_v25  ;;  %v1501_v62 = vmov 23  }
  0xb2   : > { %v567_v60 = vadd.f32 %v561_v57, %v557_v53  ;;  %v568_v61 = vadd.f32 %v562_v58, %v1687_v54  ;;  %371 = vperm.xlu0 %1238, %v356_v55  }
  0xb6   : > { %v331_v2 = vpop.permute.xlu1 %330 }
  0xb7   : > { %v333_v5 = vmul.f32 %v331_v2, %v1675_v26  ;;  %v334_v6 = vmul.f32 %v331_v2, %v1677_v27 }
  0xb9   : > { %1241 = vset.pattern.permute.xlu1 %v1489_v8  ;;  %1242 = vset.pattern.permute.xlu2 %v1481_v11  ;;  %v335_v9 = vadd.f32 %v333_v5, %v327_v63  ;;  %v336_v10 = vadd.f32 %v334_v6, %v328_v0  ;;  %v583_v42 = vpop.permute.xlu0 %582  ;;  %v365_v63 = vpop.permute.xlu2 %364  ;;  %v1502_v0 = vmov 27  }
  0xba   : > { %1243 = vset.pattern.permute.xlu0 %v1483_v13  ;;  %435 = vperm.xlu1 %1241, %v1646_v3  }
  0xbb   : > { %v1707_v12 = vadd.f32 %v339_v7, %v335_v9  ;;  %v1709_v14 = vadd.f32 %v339_v7, %v336_v10  ;;  %476 = vperm.xlu2 %1242, %v461_v4   ;;  %482 = vperm.xlu0 %1243, %v461_v4  }
  0xbd   : > { %v563_v15 = vmax.f32 %v1707_v12, 0.0  ;;  %v564_v16 = vmax.f32 %v1709_v14, 0.0  ;;  %vm349_vm11 = vcmp.gt.f32.partialorder %v1707_v12, 0.0  ;;  %vm350_vm0 = vcmp.gt.f32.partialorder %v1709_v14, 0.0 }
  0xbe   : > { %vm1897_vm2 = vmand %vm1690_vm4, %vm349_vm11 }
  0xbf   : > { %v565_v18 = vmin.f32 %v563_v15, 1.0  ;;  %v566_v11 = vmin.f32 %v564_v16, 1.0  ;;  %v1714_v19 = vpop.permute.xlu1 %358 }
  0xc1   : > { %v569_v20 = vadd.f32 %v567_v60, %v565_v18  ;;  %v570_v13 = vadd.f32 %v568_v61, %v566_v11  ;;  %v416_v2 = vpop.permute.xlu2 %415 }
  0xc2   : > { %1247 = vset.pattern.permute.xlu1 %v1490_v22  ;;  %v1768_v16 = vsub.f32 %v1677_v27, %v416_v2 }
  0xc3   : > { %v571_v23 = vmax.f32 %v569_v20, 1e-05  ;;  %v572_v28 = vmax.f32 %v570_v13, 1e-05  ;;  %1244 = vset.pattern.permute.xlu2 %v1487_v17  ;;  %1246 = vset.pattern.permute.xlu0 %v1491_v29  ;;  %v1494_v17 = vmov 21  }
  0xc4   : > { %377 = vperm.xlu2 %1244, %v356_v55   ;;  %385 = vperm.xlu0 %1246, %v1646_v3   ;;  %v1503_v29 = vmov 0.001  }
  0xc5   : > { %1259 = vrcp.f32 %v571_v23  ;;  %524 = vperm.xlu1 %1247, %v522_v21  }
  0xc6   : > { %1261 = vrcp.f32 %v572_v28 }
  0xc8   : > { %v1719_v30 = vpop.permute.xlu1 %409 }
  0xc9   : > { %v470_v4 = vpop.permute.xlu2 %469  ;;  %v412_v20 = vsub.f32 %v1671_v24, %v1719_v30  ;;  %v413_v13 = vsub.f32 %v1673_v25, %v1719_v30  ;;  %v1790_v30 = vsub.f32 %v1671_v24, %v1714_v19 }
  0xcb   : > { %v1260_v31 = vpop.eup %1259 }
  0xcc   : > { %v1262_v32 = vpop.eup %1261  ;;  %1245 = vset.pattern.permute.xlu2 %v1492_v33  ;;  %1251 = vset.pattern.permute.xlu0 %v1493_v1  ;;  %v1721_v34 = vmul.f32 %v1260_v31, %v557_v53  ;;  %v1723_v35 = vmul.f32 %v1260_v31, %v561_v57  ;;  %v1743_v53 = vmul.f32 %v1260_v31, %v565_v18  ;;  %v260_v18 = vlaneseq }
  0xcd   : > { %1249 = vset.pattern.permute.xlu1 %v1494_v17  ;;  %490 = vperm.xlu2 %1245, %v1646_v3   ;;  %v1727_v36 = vmul.f32 %v1262_v32, %v1687_v54  ;;  %v1729_v37 = vmul.f32 %v1262_v32, %v562_v58  ;;  %v1745_v54 = vmul.f32 %v1262_v32, %v566_v11 }
  0xce   : > { %756 = vperm.xlu0 %1251, %v1646_v3   ;;  %720 = vperm.xlu1 %1249, %v1646_v3   ;;  %v585_v44 = vmul.f32 %v583_v42, %v1721_v34  ;;  %vm1778_vm7 = vcmp.lt.s32.totalorder %v260_v18, 256  ;;  %v1794_v17 = vsub.f32 %v1673_v25, %v1714_v19 }
  0xcf   : > { %v586_v45 = vmul.f32 %v583_v42, %v1727_v36  ;;  %264 = vst.msk [vmem:[#allocation2] sm:$0x3] %vm1778_vm7, %v1503_v29 }
  0xd1   : > { %v1733_v38 = vpop.permute.xlu1 %463 }
  0xd2   : > { %v1802_v42 = vsub.f32 %v1673_v25, %v1733_v38 }
  0xd5   : > { %1248 = vset.pattern.permute.xlu2 %v1495_v39  ;;  %v1798_v39 = vsub.f32 %v1671_v24, %v1733_v38 }
  0xd6   : > { %1256 = vset.pattern.permute.xlu0 %v1496_v40  ;;  %1252 = vset.pattern.permute.xlu1 %v1497_v41 }
  0xd7   : > { %770 = vperm.xlu0 %1256, %v1646_v3   ;;  %640 = vperm.xlu2 %1248, %v522_v21  }
  0xd8   : > { %762 = vperm.xlu1 %1252, %v1646_v3  }
  0xda   : > { %v589_v43 = vpop.permute.xlu1 %588 }
  0xdb   : > { %v591_v46 = vmul.f32 %v589_v43, %v1723_v35  ;;  %v592_v47 = vmul.f32 %v589_v43, %v1729_v37  ;;  %v1805_v43 = vsub.f32 %v1675_v26, %v365_v63 }
  0xdd   : > { %v593_v48 = vadd.f32 %v591_v46, %v585_v44  ;;  %v594_v49 = vadd.f32 %v592_v47, %v586_v45  ;;  %v472_v44 = vsub.f32 %v1675_v26, %v470_v4  ;;  %v473_v45 = vsub.f32 %v1677_v27, %v470_v4 }
  0xdf   : > { %1250 = vset.pattern.permute.xlu2 %v1498_v50  ;;  %1258 = vset.pattern.permute.xlu0 %v1499_v51 }
  0xe0   : > { %1254 = vset.pattern.permute.xlu1 %v1500_v52  ;;  %726 = vperm.xlu2 %1250, %v1646_v3  }
  0xe1   : > { %798 = vperm.xlu1 %1254, %v1646_v3  }
  0xe3   : > { %v597_v55 = vpop.permute.xlu1 %596 }
  0xe4   : > { %v599_v57 = vmul.f32 %v597_v55, %v1743_v53  ;;  %v600_v58 = vmul.f32 %v597_v55, %v1745_v54 }
  0xe6   : > { %v601_v60 = vadd.f32 %v599_v57, %v593_v48  ;;  %v602_v61 = vadd.f32 %v600_v58, %v594_v49 }
  0xe8   : > { %1253 = vset.pattern.permute.xlu2 %v1501_v62  ;;  %v1754_v7 = vmax.f32 %v601_v60, 1e-10  ;;  %v1758_v9 = vmax.f32 %v602_v61, 1e-10 }
  0xe9   : > { %1257 = vset.pattern.permute.xlu1 %v1499_v51  ;;  %792 = vperm.xlu2 %1253, %v1646_v3  }
  0xea   : > { %806 = vperm.xlu1 %1257, %v1646_v3   ;;  %1263 = vrcp.f32 %v1754_v7  ;;  %v614_v57 = vand.u32 2147483647, %v1754_v7  ;;  %v616_v61 = vand.u32 2147483648, %v1754_v7  ;;  %v629_v62 = vand.u32 2147483647, %v1758_v9 }
  0xeb   : > { %1265 = vrcp.f32 %v1758_v9  ;;  %vm610_vm8 = vweird.f32 %v1754_v7  ;;  %vm625_vm10 = vweird.f32 %v1758_v9 }
  0xec   : > { %vm1857_vm13 = vcmp.eq.f32.partialorder %v614_v57, 8.507059e+37  ;;  %vm630_vm1 = vcmp.eq.f32.partialorder %v629_v62, 8.507059e+37 }
  0xf0   : > { %v1770_v11 = vpop.eup %1263 }
  0xf1   : > { %1255 = vset.pattern.permute.xlu2 %v1502_v0  ;;  %v606_v31 = vmul.f32 %v1770_v11, %v1754_v7  ;;  %v1786_v1 = vpop.eup %1265  ;;  %vm611_vm9 = vweird.f32 %v1770_v11 }
  0xf2   : > { %734 = vperm.xlu2 %1255, %v1646_v3   ;;  %v1765_v3 = vsub.f32 %v1675_v26, %v416_v2  ;;  %v621_v47 = vmul.f32 %v1786_v1, %v1758_v9  ;;  %v1816_v26 = vsub.f32 %v1677_v27, %v365_v63  ;;  %vm1853_vm12 = vmor %vm610_vm8, %vm611_vm9  ;;  %vm626_vm14 = vweird.f32 %v1786_v1 }
  0xf3   : > { %v607_v19 = vsub.f32 1.0, %v606_v31  ;;  %vm627_vm15 = vmor %vm625_vm10, %vm626_vm14 }
  0xf4   : > { %v622_v0 = vsub.f32 1.0, %v621_v47  ;;  %vm352_vm8 = vmand %vm1694_vm5, %vm350_vm0 }
 0x10b   : > { %v422_v5 = vpop.permute.xlu2 %421 }
 0x10c   : > { %v424_v32 = vmul.f32 %v422_v5, %v412_v20  ;;  %v425_v33 = vmul.f32 %v422_v5, %v413_v13 }
 0x115   : > { %v1752_v6 = vpop.permute.xlu2 %476 }
 0x116   : > { %v479_v50 = vmul.f32 %v1752_v6, %v1798_v39  ;;  %v480_v25 = vmul.f32 %v1752_v6, %v1802_v42 }
 0x11e   : > { %v1756_v8 = vpop.permute.xlu2 %377 }
 0x123   : > { %v428_v10 = vpop.permute.xlu1 %427 }
 0x124   : > { %v1762_v15 = vpop.permute.xlu0 %371  ;;  %v430_v22 = vmul.f32 %v428_v10, %v1765_v3  ;;  %v431_v23 = vmul.f32 %v428_v10, %v1768_v16 }
 0x125   : > { %v374_v63 = vmul.f32 %v1762_v15, %v1790_v30  ;;  %v375_v29 = vmul.f32 %v1762_v15, %v1794_v17 }
 0x126   : > { %v432_v40 = vadd.f32 %v430_v22, %v424_v32  ;;  %v433_v41 = vadd.f32 %v431_v23, %v425_v33  ;;  %v608_v22 = vmul.f32 %v1770_v11, %v607_v19  ;;  %v631_v19 = vand.u32 2147483648, %v1758_v9 }
 0x127   : > { %v491_v21 = vpop.permute.xlu2 %490 }
 0x12c   : > { %v436_v46 = vpop.permute.xlu1 %435 }
 0x12d   : > { %v438_v24 = vmul.f32 %v436_v46, %v432_v40  ;;  %v439_v48 = vmul.f32 %v436_v46, %v433_v41  ;;  %v483_v49 = vpop.permute.xlu0 %482 }
 0x12e   : > { %v485_v38 = vmul.f32 %v483_v49, %v472_v44  ;;  %v486_v51 = vmul.f32 %v483_v49, %v473_v45 }
 0x12f   : > { %v440_v52 = vmax.f32 %v438_v24, 0.0  ;;  %v441_v55 = vmax.f32 %v439_v48, 0.0  ;;  %v380_v24 = vmul.f32 %v1756_v8, %v1805_v43  ;;  %v381_v48 = vmul.f32 %v1756_v8, %v1816_v26 }
 0x130   : > { %v487_v58 = vadd.f32 %v485_v38, %v479_v50  ;;  %v488_v60 = vadd.f32 %v486_v51, %v480_v25  ;;  %v623_v38 = vmul.f32 %v1786_v1, %v622_v0 }
 0x131   : > { %v442_v2 = vmin.f32 %v440_v52, 1.0  ;;  %v443_v4 = vmin.f32 %v441_v55, 1.0  ;;  %v1821_v18 = vpop.permute.xlu2 %640 }
 0x132   : > { %v493_v23 = vmul.f32 %v491_v21, %v487_v58  ;;  %v494_v27 = vmul.f32 %v491_v21, %v488_v60 }
 0x133   : > { %v444_v31 = vmul.f32 %v442_v2, %v422_v5  ;;  %v445_v32 = vmul.f32 %v443_v4, %v422_v5  ;;  %v448_v33 = vmul.f32 %v442_v2, %v428_v10  ;;  %v449_v40 = vmul.f32 %v443_v4, %v428_v10 }
 0x134   : > { %v495_v41 = vmax.f32 %v493_v23, 0.0  ;;  %v496_v46 = vmax.f32 %v494_v27, 0.0  ;;  %v1836_v10 = vadd.f32 %v1770_v11, %v608_v22 }
 0x135   : > { %v446_v47 = vsub.f32 %v412_v20, %v444_v31  ;;  %v447_v21 = vsub.f32 %v413_v13, %v445_v32  ;;  %v450_v51 = vsub.f32 %v1765_v3, %v448_v33  ;;  %v451_v52 = vsub.f32 %v1768_v16, %v449_v40 }
 0x136   : > { %v497_v50 = vmin.f32 %v495_v41, 1.0  ;;  %v498_v5 = vmin.f32 %v496_v46, 1.0  ;;  %v386_v25 = vpop.permute.xlu0 %385  ;;  %v382_v20 = vadd.f32 %v380_v24, %v374_v63  ;;  %v383_v13 = vadd.f32 %v381_v48, %v375_v29 }
 0x137   : > { %v1841_v55 = vpop.permute.xlu1 %524  ;;  %v452_v23 = vmul.f32 %v446_v47, %v446_v47  ;;  %v453_v27 = vmul.f32 %v447_v21, %v447_v21  ;;  %v454_v29 = vmul.f32 %v450_v51, %v450_v51  ;;  %v455_v33 = vmul.f32 %v451_v52, %v451_v52 }
 0x138   : > { %v499_v58 = vmul.f32 %v497_v50, %v1752_v6  ;;  %v500_v60 = vmul.f32 %v498_v5, %v1752_v6  ;;  %v503_v2 = vmul.f32 %v497_v50, %v483_v49  ;;  %v504_v4 = vmul.f32 %v498_v5, %v483_v49 }
 0x139   : > { %v388_v22 = vmul.f32 %v386_v25, %v382_v20  ;;  %v389_v31 = vmul.f32 %v386_v25, %v383_v13  ;;  %v624_v48 = vadd.f32 %v1786_v1, %v623_v38  ;;  %v632_v50 = vor.u32 1.1754944e-38, %v631_v19 }
 0x13a   : > { %v501_v0 = vsub.f32 %v1798_v39, %v499_v58  ;;  %v502_v3 = vsub.f32 %v1802_v42, %v500_v60  ;;  %v505_v32 = vsub.f32 %v472_v44, %v503_v2  ;;  %v506_v16 = vsub.f32 %v473_v45, %v504_v4  ;;  %v727_v63 = vpop.permute.xlu2 %726 }
 0x13b   : > { %v390_v40 = vmax.f32 %v388_v22, 0.0  ;;  %v391_v41 = vmax.f32 %v389_v31, 0.0  ;;  %v617_v44 = vor.u32 1.1754944e-38, %v616_v61  ;;  %v613_v45 = vsel %vm1853_vm12, %v1770_v11, %v1836_v10 }
 0x13c   : > { %v507_v6 = vmul.f32 %v501_v0, %v501_v0  ;;  %v508_v46 = vmul.f32 %v502_v3, %v502_v3  ;;  %v509_v49 = vmul.f32 %v505_v32, %v505_v32  ;;  %v510_v47 = vmul.f32 %v506_v16, %v506_v16 }
 0x13d   : > { %v392_v21 = vmin.f32 %v390_v40, 1.0  ;;  %v393_v24 = vmin.f32 %v391_v41, 1.0  ;;  %v456_v51 = vadd.f32 %v454_v29, %v452_v23  ;;  %v457_v61 = vadd.f32 %v455_v33, %v453_v27 }
 0x13e   : > { %v511_v52 = vadd.f32 %v509_v49, %v507_v6  ;;  %v512_v20 = vadd.f32 %v510_v47, %v508_v46  ;;  %v730_v60 = vmul.f32 %v727_v63, %v1729_v37  ;;  %vm526_vm3 = vcmp.eq.s32.totalorder %v1841_v55, 1 }
 0x13f   : > { %v394_v7 = vmul.f32 %v392_v21, %v1762_v15  ;;  %v395_v5 = vmul.f32 %v393_v24, %v1762_v15  ;;  %v398_v57 = vmul.f32 %v392_v21, %v1756_v8  ;;  %v399_v25 = vmul.f32 %v393_v24, %v1756_v8 }
 0x140   : > { %v757_v13 = vpop.permute.xlu0 %756  ;;  %v721_v58 = vpop.permute.xlu1 %720  ;;  %v729_v15 = vmul.f32 %v727_v63, %v1723_v35  ;;  %v513_v32 = vmin.f32 %v456_v51, %v511_v52  ;;  %v514_v16 = vmin.f32 %v457_v61, %v512_v20  ;;  %vm642_vm12 = vcmp.eq.s32.totalorder %v1821_v18, 1 }
 0x141   : > { %v396_v11 = vsub.f32 %v1790_v30, %v394_v7  ;;  %v397_v10 = vsub.f32 %v1794_v17, %v395_v5  ;;  %v400_v19 = vsub.f32 %v1805_v43, %v398_v57  ;;  %v401_v38 = vsub.f32 %v1816_v26, %v399_v25 }
 0x142   : > { %v723_v8 = vmul.f32 %v721_v58, %v1721_v34  ;;  %v724_v2 = vmul.f32 %v721_v58, %v1727_v36  ;;  %v1887_v17 = vsel %vm1857_vm13, %v617_v44, %v613_v45  ;;  %v628_v43 = vsel %vm627_vm15, %v1786_v1, %v624_v48 }
 0x143   : > { %v402_v4 = vmul.f32 %v396_v11, %v396_v11  ;;  %v403_v23 = vmul.f32 %v397_v10, %v397_v10  ;;  %v404_v27 = vmul.f32 %v400_v19, %v400_v19  ;;  %v405_v22 = vmul.f32 %v401_v38, %v401_v38  ;;  %v1883_v30 = vpop.permute.xlu2 %792 }
 0x144   : > { %v731_v26 = vadd.f32 %v729_v15, %v723_v8  ;;  %v732_v31 = vadd.f32 %v730_v60, %v724_v2  ;;  %v633_v33 = vsel %vm630_vm1, %v632_v50, %v628_v43  ;;  %v635_v40 = vsub.f32 100.0, %v1887_v17 }
 0x145   : > { %v406_v0 = vadd.f32 %v404_v27, %v402_v4  ;;  %v407_v3 = vadd.f32 %v405_v22, %v403_v23  ;;  %vm645_vm6 = vcmp.ge.f32.partialorder %v1887_v17, 1.0  ;;  %v636_v56 = vsub.f32 100.0, %v633_v33 }
 0x146   : > { %v759_v62 = vmul.f32 %v757_v13, %v1721_v34  ;;  %v760_v41 = vmul.f32 %v757_v13, %v1727_v36  ;;  %vm646_vm15 = vcmp.ge.f32.partialorder %v633_v33, 1.0  ;;  %v1504_v13 = vmov 0.0  }
 0x147   : > { %v515_v63 = vmin.f32 %v406_v0, %v513_v32  ;;  %v516_v29 = vmin.f32 %v407_v3, %v514_v16  ;;  %265 = vst.msk [vmem:[#allocation3] sm:$0x3] %vm1778_vm7, %v1504_v13  ;;  %v637_v18 = vmul.f32 0.01010101, %v635_v40  ;;  %v638_v10 = vmul.f32 0.01010101, %v636_v56 }
 0x148   : > { %266 = vst [vmem:[#allocation4] sm:$0x77] %v1504_v13  ;;  %v795_v38 = vmul.f32 %v1883_v30, %v1721_v34  ;;  %v796_v15 = vmul.f32 %v1883_v30, %v1727_v36  ;;  %v667_v56 = vld [vmem:[#allocation2] sm:$0x3] }
 0x149   : > { %vm518_vm9 = vcmp.lt.f32.partialorder %v515_v63, 9.2102404e-05  ;;  %vm519_vm10 = vcmp.lt.f32.partialorder %v516_v29, 9.2102404e-05  ;;  %v529_v14 = vsub.f32 0.0, %v515_v63  ;;  %v530_v9 = vsub.f32 0.0, %v516_v29  ;;  %v771_v12 = vpop.permute.xlu0 %770 }
 0x14a   : > { %vm520_vm4 = vmor %vm1897_vm2, %vm518_vm9  ;;  %v763_v6 = vpop.permute.xlu1 %762  ;;  %v773_v42 = vmul.f32 %v771_v12, %v1743_v53  ;;  %v774_v44 = vmul.f32 %v771_v12, %v1745_v54 }
 0x14b   : > { %vm521_vm11 = vmor %vm352_vm8, %vm519_vm10  ;;  %v531_v59 = vsel %vm1897_vm2, %v529_v14, %v515_v63  ;;  %v532_v46 = vsel %vm352_vm8, %v530_v9, %v516_v29  ;;  %v765_v49 = vmul.f32 %v763_v6, %v1723_v35  ;;  %v766_v47 = vmul.f32 %v763_v6, %v1729_v37 }
 0x14c   : > { %vm1917_vm5 = vmand %vm520_vm4, %vm526_vm3  ;;  %v533_v24 = vmul.f32 100000.0, %v531_v59  ;;  %v534_v39 = vmul.f32 100000.0, %v532_v46  ;;  %v735_v45 = vpop.permute.xlu2 %734  ;;  %vm650_vm8 = vcmp.le.f32.partialorder %v633_v33, 100.0  ;;  %vm832_vm4 = vcmask 1043456  }
 0x14d   : > { %vm1925_vm13 = vmand %vm521_vm11, %vm526_vm3  ;;  %v767_v50 = vadd.f32 %v765_v49, %v759_v62  ;;  %v768_v7 = vadd.f32 %v766_v47, %v760_v41  ;;  %v737_v5 = vmul.f32 %v735_v45, %v1743_v53  ;;  %v738_v57 = vmul.f32 %v735_v45, %v1745_v54 }
 0x14e   : > { %v535_v25 = vmin.f32 %v533_v24, 80.0  ;;  %v536_v51 = vmin.f32 %v534_v39, 80.0  ;;  %vm643_vm14 = vmand %vm1917_vm5, %vm642_vm12  ;;  %vm649_vm3 = vcmp.le.f32.partialorder %v1887_v17, 100.0 }
 0x14f   : > { %vm644_vm0 = vmand %vm1925_vm13, %vm642_vm12  ;;  %v1939_v55 = vadd.f32 %v773_v42, %v767_v50  ;;  %v1941_v61 = vadd.f32 %v774_v44, %v768_v7  ;;  %v1943_v52 = vadd.f32 %v737_v5, %v731_v26  ;;  %v1945_v20 = vadd.f32 %v738_v57, %v732_v31 }
 0x150   : > { %v537_v58 = vmul.f32 1.442695, %v535_v25  ;;  %v539_v11 = vmul.f32 1.442695, %v536_v51  ;;  %vm647_vm1 = vmand %vm643_vm14, %vm645_vm6  ;;  %vm671_vm6 = vcmask 1040384   ;;  %vm838_vm12 = vcmask 1041408  }
 0x151   : > { %vm648_vm2 = vmand %vm644_vm0, %vm646_vm15  ;;  %vm945_vm14 = vcmask 1042432  }
 0x152   : > { %1267 = vpow2.f32 %v537_v58  ;;  %vm651_vm9 = vmand %vm647_vm1, %vm649_vm3 }
 0x153   : > { %1269 = vpow2.f32 %v539_v11  ;;  %vm652_vm10 = vmand %vm648_vm2, %vm650_vm8  ;;  %v653_v19 = vsel %vm651_vm9, %v637_v18, -inf  ;;  %v799_v60 = vpop.permute.xlu1 %798 }
 0x154   : > { %v654_v8 = vsel %vm652_vm10, %v638_v10, -inf  ;;  %v655_v2 = vrot.slane %v653_v19, 4  ;;  %v801_v4 = vmul.f32 %v799_v60, %v1723_v35  ;;  %v802_v23 = vmul.f32 %v799_v60, %v1729_v37 }
 0x155   : > { %v661_v27 = vrot.slane %v654_v8, 4 }
 0x156   : > { %v656_v22 = vmax.f32 %v653_v19, %v655_v2  ;;  %v803_v17 = vadd.f32 %v801_v4, %v795_v38  ;;  %v804_v43 = vadd.f32 %v802_v23, %v796_v15 }
 0x157   : > { %v662_v26 = vmax.f32 %v654_v8, %v661_v27 }
 0x158   : > { %v1268_v31 = vpop.eup %1267  ;;  %v657_v0 = vrot.slane %v656_v22, 2 }
 0x159   : > { %v1270_v3 = vpop.eup %1269  ;;  %v541_v32 = vadd.f32 1.0, %v1268_v31  ;;  %v663_v34 = vrot.slane %v662_v26, 2 }
 0x15a   : > { %v542_v16 = vadd.f32 1.0, %v1270_v3  ;;  %v658_v63 = vmax.f32 %v656_v22, %v657_v0 }
 0x15b   : > { %1271 = vrcp.f32 %v541_v32  ;;  %v664_v36 = vmax.f32 %v662_v26, %v663_v34 }
 0x15c   : > { %1273 = vrcp.f32 %v542_v16  ;;  %v807_v30 = vpop.permute.xlu1 %806  ;;  %v659_v29 = vrot.slane %v658_v63, 1 }
 0x15d   : > { %v665_v35 = vrot.slane %v664_v36, 1  ;;  %v809_v37 = vmul.f32 %v807_v30, %v1743_v53  ;;  %v810_v33 = vmul.f32 %v807_v30, %v1745_v54 }
 0x15e   : > { %v660_v12 = vmax.f32 %v658_v63, %v659_v29 }
 0x15f   : > { %v666_v1 = vmax.f32 %v664_v36, %v665_v35  ;;  %v811_v40 = vadd.f32 %v809_v37, %v803_v17  ;;  %v812_v14 = vadd.f32 %v810_v33, %v804_v43 }
 0x161   : > { %v1272_v9 = vpop.eup %1271  ;;  %v670_v62 = vrot.slane %v666_v1, 7 }
 0x162   : > { %v1274_v41 = vpop.eup %1273  ;;  %v547_v6 = vsub.f32 1.0, %v1272_v9 }
 0x163   : > { %v548_v59 = vsub.f32 1.0, %v1274_v41  ;;  %v672_v46 = vsel %vm671_vm6, %v660_v12, %v670_v62 }
 0x164   : > { %v1963_v49 = vsel %vm1917_vm5, %v547_v6, 1.0  ;;  %v674_v53 = vmax.f32 %v667_v56, %v672_v46 }
 0x165   : > { %v1967_v54 = vsel %vm1925_vm13, %v548_v59, 1.0 }
 0x166   : > { %v675_v47 = vsub.f32 %v667_v56, %v674_v53  ;;  %v680_v24 = vperm.slane %v674_v53, 0  ;;  %v681_v39 = vperm.slane %v674_v53, 1  ;;  %848 = vst.msk [vmem:[#allocation2] sm:$0x3] %vm1778_vm7, %v674_v53  ;;  %v895_v10 = vrot.slane %v1967_v54, 4 }
 0x168   : > { %v676_v42 = vmul.f32 10000.0, %v675_v47  ;;  %v684_v44 = vsub.f32 %v653_v19, %v680_v24  ;;  %v685_v45 = vsub.f32 %v654_v8, %v681_v39 }
 0x16a   : > { %v677_v50 = vmul.f32 1.442695, %v676_v42  ;;  %v686_v7 = vmul.f32 10000.0, %v684_v44  ;;  %v687_v5 = vmul.f32 10000.0, %v685_v45 }
 0x16c   : > { %v688_v21 = vmul.f32 1.442695, %v686_v7  ;;  %v690_v57 = vmul.f32 1.442695, %v687_v5  ;;  %1275 = vpow2.f32 %v677_v50  ;;  %v694_v50 = vld [vmem:[#allocation3] sm:$0x3] }
 0x16d   : > { %v852_v48 = vld [vmem:[#allocation2] sm:$0x3] }
 0x16e   : > { %1277 = vpow2.f32 %v688_v21  ;;  %v853_v51 = vsub.f32 0.001, %v852_v48 }
 0x16f   : > { %1279 = vpow2.f32 %v690_v57 }
 0x170   : > { %v1976_v60 = vmul.f32 10000.0, %v853_v51 }
 0x172   : > { %v1971_v25 = vpop.eup %1275 }
 0x173   : > { %v830_v23 = vperm.slane %v1971_v25, 1 }
 0x174   : > { %v1278_v13 = vpop.eup %1277 }
 0x175   : > { %v1280_v58 = vpop.eup %1279  ;;  %v692_v11 = vmul.f32 %v1278_v13, %v1272_v9  ;;  %v831_v24 = vrot.slane %v830_v23, 4  ;;  %v894_v23 = vrot.slane %v1963_v49, 4 }
 0x176   : > { %v693_v18 = vmul.f32 %v1280_v58, %v1274_v41 }
 0x177   : > { %v696_v19 = vrot.slane %v692_v11, 4  ;;  %v777_v38 = vmul.f32 %v1939_v55, %v692_v11  ;;  %v741_v15 = vmul.f32 %v1943_v52, %v692_v11  ;;  %v813_v43 = vmul.f32 %v811_v40, %v692_v11 }
 0x178   : > { %v702_v8 = vrot.slane %v693_v18, 4  ;;  %v778_v2 = vmul.f32 %v1941_v61, %v693_v18  ;;  %v742_v4 = vmul.f32 %v1945_v20, %v693_v18  ;;  %v814_v3 = vmul.f32 %v812_v14, %v693_v18 }
 0x179   : > { %v697_v27 = vadd.f32 %v696_v19, %v692_v11  ;;  %v779_v22 = vrot.slane %v777_v38, 4  ;;  %v743_v17 = vrot.slane %v741_v15, 4  ;;  %v815_v34 = vrot.slane %v813_v43, 4 }
 0x17a   : > { %v703_v26 = vadd.f32 %v702_v8, %v693_v18  ;;  %v785_v31 = vrot.slane %v778_v2, 4  ;;  %v749_v0 = vrot.slane %v742_v4, 4  ;;  %v821_v61 = vrot.slane %v814_v3, 4 }
 0x17b   : > { %v698_v55 = vrot.slane %v697_v27, 2  ;;  %v780_v32 = vadd.f32 %v779_v22, %v777_v38  ;;  %v744_v52 = vadd.f32 %v743_v17, %v741_v15  ;;  %v816_v35 = vadd.f32 %v815_v34, %v813_v43  ;;  %v827_v22 = vld [vmem:[#allocation4] sm:$0x77] }
 0x17c   : > { %v704_v16 = vrot.slane %v703_v26, 2  ;;  %v786_v63 = vadd.f32 %v785_v31, %v778_v2  ;;  %v750_v36 = vadd.f32 %v749_v0, %v742_v4  ;;  %v822_v40 = vadd.f32 %v821_v61, %v814_v3 }
 0x17d   : > { %v699_v20 = vadd.f32 %v698_v55, %v697_v27  ;;  %v781_v30 = vrot.slane %v780_v32, 2  ;;  %v745_v29 = vrot.slane %v744_v52, 2  ;;  %v817_v56 = vrot.slane %v816_v35, 2 }
 0x17e   : > { %v705_v37 = vadd.f32 %v704_v16, %v703_v26  ;;  %v787_v33 = vrot.slane %v786_v63, 2  ;;  %v751_v1 = vrot.slane %v750_v36, 2  ;;  %v823_v59 = vrot.slane %v822_v40, 2 }
 0x17f   : > { %v700_v9 = vrot.slane %v699_v20, 1  ;;  %v782_v14 = vadd.f32 %v781_v30, %v780_v32  ;;  %v746_v12 = vadd.f32 %v745_v29, %v744_v52  ;;  %v818_v47 = vadd.f32 %v817_v56, %v816_v35 }
 0x180   : > { %v706_v62 = vrot.slane %v705_v37, 1  ;;  %v788_v41 = vadd.f32 %v787_v33, %v786_v63  ;;  %v752_v6 = vadd.f32 %v751_v1, %v750_v36  ;;  %v824_v45 = vadd.f32 %v823_v59, %v822_v40 }
 0x181   : > { %v783_v46 = vrot.slane %v782_v14, 1  ;;  %v747_v53 = vrot.slane %v746_v12, 1  ;;  %v701_v7 = vadd.f32 %v700_v9, %v699_v20  ;;  %v819_v57 = vrot.slane %v818_v47, 1 }
 0x182   : > { %v707_v39 = vadd.f32 %v706_v62, %v705_v37  ;;  %v789_v42 = vrot.slane %v788_v41, 1  ;;  %v753_v44 = vrot.slane %v752_v6, 1  ;;  %v825_v58 = vrot.slane %v824_v45, 1 }
 0x183   : > { %v784_v5 = vadd.f32 %v783_v46, %v782_v14  ;;  %v748_v21 = vadd.f32 %v747_v53, %v746_v12  ;;  %v820_v18 = vadd.f32 %v819_v57, %v818_v47  ;;  %v695_v19 = vmul.f32 %v1971_v25, %v694_v50 }
 0x184   : > { %v710_v48 = vrot.slane %v707_v39, 7  ;;  %v790_v51 = vadd.f32 %v789_v42, %v788_v41  ;;  %v754_v13 = vadd.f32 %v753_v44, %v752_v6  ;;  %v829_v38 = vperm.slane %v1971_v25, 0 }
 0x185   : > { %v836_v11 = vsel %vm671_vm6, %v748_v21, %v784_v5  ;;  %v826_v2 = vadd.f32 %v825_v58, %v824_v45  ;;  %v855_v4 = vmul.f32 1.442695, %v1976_v60  ;;  %v899_v25 = vmul.f32 %v895_v10, %v1967_v54 }
 0x186   : > { %v711_v15 = vsel %vm671_vm6, %v701_v7, %v710_v48  ;;  %v837_v8 = vsel %vm671_vm6, %v754_v13, %v790_v51  ;;  %v833_v17 = vsel %vm832_vm4, %v829_v38, %v831_v24  ;;  %v839_v43 = vsel %vm838_vm12, %v836_v11, %v820_v18 }
 0x187   : > { %v713_v27 = vadd.f32 %v711_v15, %v695_v19  ;;  %v840_v26 = vsel %vm838_vm12, %v837_v8, %v826_v2  ;;  %v835_v0 = vmul.f32 %v833_v17, %v827_v22  ;;  %1281 = vpow2.f32 %v855_v4 }
 0x188   : > { %v843_v31 = vrot.slane %v840_v26, 4  ;;  %v898_v60 = vmul.f32 %v894_v23, %v1963_v49  ;;  %v903_v32 = vrot.slane %v899_v25, 2  ;;  %v1505_v30 = vmov 286326784  }
 0x189   : > { %718 = vst.msk [vmem:[#allocation3] sm:$0x3] %vm1778_vm7, %v713_v27  ;;  %v878_v29 = vunpack.c.l.s4 %v1505_v30 }
 0x18a   : > { %v844_v3 = vsel %vm832_vm4, %v839_v43, %v843_v31  ;;  %v902_v52 = vrot.slane %v898_v60, 2  ;;  %v907_v63 = vmul.f32 %v903_v32, %v899_v25 }
 0x18b   : > { %v846_v55 = vadd.f32 %v844_v3, %v835_v0  ;;  %v879_v40 = vunpack.c.0.s8 %v878_v29 }
 0x18c   : > { %v906_v61 = vmul.f32 %v902_v52, %v898_v60  ;;  %v911_v54 = vrot.slane %v907_v63, 1 }
 0x18d   : > { %847 = vst [vmem:[#allocation4] sm:$0x77] %v846_v55  ;;  %v1282_v34 = vpop.eup %1281 }
 0x18e   : > { %v910_v10 = vrot.slane %v906_v61, 1  ;;  %v915_v20 = vmul.f32 %v911_v54, %v907_v63  ;;  %v875_v12 = vmul.f32 0.0, %v1282_v34 }
 0x190   : > { %v857_v16 = vld [vmem:[#allocation3] sm:$0x3]  ;;  %v914_v49 = vmul.f32 %v910_v10, %v906_v61  ;;  %v917_v33 = vsub.f32 1.0, %v915_v20  ;;  %v880_v53 = vperm.slane %v875_v12, %v879_v40 }
 0x191   : > { %v858_v36 = vadd.f32 %v1282_v34, %v857_v16 }
 0x192   : > { %v916_v56 = vsub.f32 1.0, %v914_v49  ;;  %v919_v59 = vmax.f32 %v917_v33, 0.0 }
 0x193   : > { %1283 = vrcp.f32 %v858_v36  ;;  %v870_v1 = vand.u32 2147483648, %v858_v36  ;;  %v868_v14 = vand.u32 2147483647, %v858_v36  ;;  %vm864_vm11 = vweird.f32 %v858_v36 }
 0x194   : > { %v874_v6 = vld [vmem:[#allocation4] sm:$0x77]  ;;  %v918_v47 = vmax.f32 %v916_v56, 0.0  ;;  %v921_v44 = vmin.f32 %v919_v59, 1.0 }
 0x195   : > { %v871_v41 = vor.u32 1.1754944e-38, %v870_v1  ;;  %vm869_vm13 = vcmp.eq.f32.partialorder %v868_v14, 8.507059e+37  ;;  %v882_v39 = vadd.f32 %v880_v53, %v874_v6 }
 0x196   : > { %v920_v50 = vmin.f32 %v918_v47, 1.0  ;;  %v938_v13 = vrot.slane %v921_v44, 5 }
 0x198   : > { %v937_v38 = vrot.slane %v920_v50, 5 }
 0x199   : > { %v1284_v28 = vpop.eup %1283 }
 0x19a   : > { %v860_v35 = vmul.f32 %v1284_v28, %v858_v36  ;;  %vm865_vm7 = vweird.f32 %v1284_v28 }
 0x19b   : > { %vm866_vm5 = vmor %vm864_vm11, %vm865_vm7 }
 0x19c   : > { %v861_v37 = vsub.f32 1.0, %v860_v35 }
 0x19e   : > { %v862_v9 = vmul.f32 %v1284_v28, %v861_v37 }
 0x1a0   : > { %v863_v62 = vadd.f32 %v1284_v28, %v862_v9 }
 0x1a2   : > { %v867_v46 = vsel %vm866_vm5, %v1284_v28, %v863_v62 }
 0x1a3   : > { %v872_v24 = vsel %vm869_vm13, %v871_v41, %v867_v46 }
 0x1a4   : > { %v887_v42 = vperm.slane %v872_v24, %v879_v40 }
 0x1a6   : > { %v889_v45 = vmul.f32 %v887_v42, %v882_v39 }
 0x1a8   : > { %v923_v7 = vperm.slane %v889_v45, 0  ;;  %v924_v5 = vperm.slane %v889_v45, 4  ;;  %v927_v21 = vperm.slane %v889_v45, 1  ;;  %v928_v57 = vperm.slane %v889_v45, 5 }
 0x1a9   : > { %v931_v48 = vperm.slane %v889_v45, 2  ;;  %v932_v51 = vperm.slane %v889_v45, 6 }
 0x1aa   : > { %v941_v58 = vsel %vm671_vm6, %v923_v7, %v927_v21  ;;  %v942_v11 = vsel %vm671_vm6, %v924_v5, %v928_v57 }
 0x1ab   : > { %v943_v18 = vsel %vm838_vm12, %v941_v58, %v931_v48  ;;  %v944_v19 = vsel %vm838_vm12, %v942_v11, %v932_v51 }
 0x1ac   : > { %v947_v15 = vsel %vm945_vm14, %v944_v19, %v938_v13  ;;  %v946_v2 = vsel %vm945_vm14, %v943_v18, %v937_v38 }
 0x1ad   : > { %v950_v8 = vrot.slane %v947_v15, 4 }
 0x1af   : > { %v951_v4 = vsel %vm832_vm4, %v946_v2, %v950_v8 }
 0x1b0   : > { %953 = vst [vmem:[%s252_s15] sm:$0xff] %v951_v4 }
 0x1b1   : > { %1402 = shalt.err (!%p1399_p0)
}
 0x1b2   : > { %1110 = dma.vmem_to_hbm [thread:$0]  (%p1605_p7), %s971_s27, 128, %s973_s28, %s955_s29  }
 0x1b3 PF: > { %s984_s8 = sand.u32 1, %s1445_s12   ;;  %p1124_p3 = pnand %p1086_p9, %p1571_p6 }
 0x1b4   : > { %s985_s18 = scalar_lea.sflag [#allocation8], %s984_s8 }
 0x1b5   : > { %p1125_p5 = pneg %p1124_p3 }
 0x1b7   : > { %1440 = dma.done.wait (%p1125_p5), %s985_s18, 128  }
 0x1b8   : > { %1442 = vsyncadd (%p1125_p5), %s985_s18, 4294967168  ;;  %s18_s17 = sadd.s32 1, %s1465_s17   ;;  %s2068_s12 = smov %s1449_s13 }
 0x1b9   : > { %p15_p10 = scmp.ge.s32.totalorder %s18_s17, 4   ;;  %s2069_s13 = smov %s1453_s14 }
 0x1ba   : > { %s2070_s14 = smov %s1615_s23  ;;  %s2071_s15 = smov %s1461_s16 }
 0x1bb   : > { %s2072_s16 = smov %s2074_s6  ;;  %17 = sbr.rel (!%p15_p10) target bundleno = 6 (0x6), region = 94 }
 0x1c0   :  { %991 = vsyncpa [#allocation7], 1 }
 0x1c1   :  { %993 = vsyncpa [#allocation7 + $0x1], 1 }
 0x1c2   :  { %994 = vsyncpa [#allocation10], 1 }
 0x1c3   :  { %995 = vsyncpa [#allocation8], 1 }
 0x1c4   :  { %997 = vsyncpa [#allocation8 + $0x1], 1 }

</bundles_post_ra>
